<compile_context>
chip_gen: v7x
topology: tpu7x:2x2x1
jax: 0.10.0
libtpu: 0.0.40
codegen_flags: <defaults>
</compile_context>

<pallas_src>
import jax
import jax.numpy as jnp
from jax import lax
from jax.experimental import pallas as pl
from jax.experimental.pallas import tpu as pltpu
import numpy as np

C_IN, C_OUT, KSIZE, STRIDE, PAD = 4, 9, 3, 2, 3
BN_EPS = 1e-5


def _make_fused_kernel(ho, wo):
    """Build the fused kernel for a given conv output size (static shapes)."""

    def kernel(w_ref, p_ref, b_ref, g_ref, be_ref, o_ref, sA3, sB3):
        # ---- conv as matmul (MXU) + bias ---------------------------------
        v1 = jnp.dot(w_ref[...], p_ref[...],
                     preferred_element_type=jnp.float32) + b_ref[...]   # (C, P)
        # ---- BatchNorm2d, training mode (batch stats, biased variance) ---
        mean = jnp.mean(v1, axis=1, keepdims=True)
        var = jnp.mean(jnp.square(v1 - mean), axis=1, keepdims=True)
        v2 = (v1 - mean) * lax.rsqrt(var + BN_EPS) * g_ref[...] + be_ref[...]
        # ---- tanh-GELU chain (v3..v11) ------------------------------------
        inner = 0.7978845608028654 * (v2 + 0.044715 * v2 * v2 * v2)
        v11 = (0.5 * v2) * (jnp.tanh(inner) + 1.0)
        # ---- A = v11**-0.5 (NaN<0, inf at 0, matches torch.pow) ------------
        A2 = lax.rsqrt(v11)                                    # (C, P): A[c, h*wo+w]
        # ---- B = softmax over the channel axis ------------------------------
        m = jnp.max(v11, axis=0, keepdims=True)
        e = jnp.exp(v11 - m)
        inv = pl.reciprocal(jnp.sum(e, axis=0, keepdims=True), approx=True)
        B2 = e * inv                                           # (C, P): B[c, h*wo+w]

        # ---- one-time channel<->height block transpose via VMEM scratch ----
        #   sX3[h, c, w] = X[c, h, w]  (9 lane-slice stores per array)
        for h in range(ho):
            sA3[h] = A2[:, h * wo:(h + 1) * wo]
            sB3[h] = B2[:, h * wo:(h + 1) * wo]
        #   XT2[h, c*wo + w] = X[c, h, w]  -> (ho, C*wo) lane-dense tiles
        AT2 = jnp.concatenate([sA3[:, c, :] for c in range(C_OUT)], axis=1)
        BT2 = jnp.concatenate([sB3[:, c, :] for c in range(C_OUT)], axis=1)

        # ---- assemble v39 in flat layout: o[i, j, k*wo+w] -------------------
        #   term1[j, k*wo+w] = A[j,k,w] + B[j,i,w]
        #   term2[j, k*wo+w] = relu(A[k,j,w] * B[k,i,w])
        for i in range(ho):
            term1 = A2 + jnp.tile(B2[:, i * wo:(i + 1) * wo], (1, ho))
            term2 = jnp.maximum(AT2 * BT2[i:i + 1, :], 0.0)
            o_ref[i] = term1 * term2

    return kernel


@jax.jit
def model_forward(x, conv_w, conv_b, bn_gamma, bn_beta):
    n, c_in, h, w = x.shape
    assert n == 1 and c_in == C_IN
    ho = (h + 2 * PAD - KSIZE) // STRIDE + 1
    wo = (w + 2 * PAD - KSIZE) // STRIDE + 1
    # The v39 broadcast chain (v37 * v38) is only defined when Ho == C_OUT.
    assert ho == C_OUT, "v39 requires conv output height == out_channels (9)"

    kdim = C_IN * KSIZE * KSIZE
    # im2col in a single XLA op; feature ordering is (c_in, kh, kw), which
    # matches the OIHW flatten of conv_w below.  No explicit K padding.
    patches = lax.conv_general_dilated_patches(
        x, (KSIZE, KSIZE), (STRIDE, STRIDE), ((PAD, PAD), (PAD, PAD)),
        dimension_numbers=("NCHW", "OIHW", "NCHW"))             # (1, kdim, ho, wo)
    patches = patches.reshape(kdim, ho * wo)                    # (36, P)
    w2 = conv_w.reshape(C_OUT, kdim)                            # (9, 36)
    b2 = conv_b.reshape(C_OUT, 1)
    g2 = bn_gamma.reshape(C_OUT, 1)
    be2 = bn_beta.reshape(C_OUT, 1)

    vmem = pl.BlockSpec(memory_space=pltpu.MemorySpace.VMEM)
    out_flat = pl.pallas_call(
        _make_fused_kernel(ho, wo),
        out_shape=jax.ShapeDtypeStruct((ho, C_OUT, ho * wo), jnp.float32),
        in_specs=[vmem] * 5,
        out_specs=vmem,
        scratch_shapes=[
            pltpu.VMEM((ho, C_OUT, wo), jnp.float32),   # A in [h, c, w]
            pltpu.VMEM((ho, C_OUT, wo), jnp.float32),   # B in [h, c, w]
        ],
    )(w2, patches, b2, g2, be2)
    # Row-major compatible free view: o[i, j, k*wo+w] -> v39[i, j, k, w].
    return out_flat.reshape(ho, C_OUT, ho, wo)


@jax.jit
def reference_forward(x, conv_w, conv_b, bn_gamma, bn_beta):
    """Pure-JAX mirror of the torch forward (v39 dependency chain only)."""
    v1 = lax.conv_general_dilated(x, conv_w, (STRIDE, STRIDE),
                                  ((PAD, PAD), (PAD, PAD)),
                                  dimension_numbers=("NCHW", "OIHW", "NCHW"))
    v1 = v1 + conv_b.reshape(1, C_OUT, 1, 1)
    mean = jnp.mean(v1, axis=(0, 2, 3), keepdims=True)
    var = jnp.mean(jnp.square(v1 - mean), axis=(0, 2, 3), keepdims=True)
    v2 = ((v1 - mean) * lax.rsqrt(var + BN_EPS)
          * bn_gamma.reshape(1, C_OUT, 1, 1) + bn_beta.reshape(1, C_OUT, 1, 1))
    v3 = v2 * 0.5
    v7 = v2 + (v2 * v2 * v2) * 0.044715
    v11 = v3 * (jnp.tanh(v7 * 0.7978845608028654) + 1.0)
    v13 = jnp.swapaxes(v11, 0, 1)
    v16 = jax.nn.softmax(v13, axis=0)
    v31 = jnp.swapaxes(v13, 0, 1)
    v33 = lax.rsqrt(v31)
    v34 = jnp.swapaxes(jnp.swapaxes(v16, 1, 2), 0, 1)
    v35 = v33 * v34
    v36 = jnp.swapaxes(v35, 1, 2)
    v37 = v33 + v34
    v38 = jnp.maximum(v36, 0.0)
    return v37 * v38


if __name__ == "__main__":
    key = jax.random.PRNGKey(0)
    kx, kw, kb = jax.random.split(key, 3)
    # H=13, W=27 -> conv output (1, 9, 9, 16); Ho == 9 makes v39 well defined.
    x = jax.random.normal(kx, (1, C_IN, 13, 27), jnp.float32)
    conv_w = jax.random.normal(kw, (C_OUT, C_IN, KSIZE, KSIZE), jnp.float32) * 0.2
    conv_b = jax.random.normal(kb, (C_OUT,), jnp.float32) * 0.1
    bn_gamma = jnp.ones((C_OUT,), jnp.float32)   # torch BatchNorm2d default affine init
    bn_beta = jnp.zeros((C_OUT,), jnp.float32)

    out = jax.block_until_ready(model_forward(x, conv_w, conv_b, bn_gamma, bn_beta))
    ref = jax.block_until_ready(reference_forward(x, conv_w, conv_b, bn_gamma, bn_beta))

    out_np, ref_np = np.asarray(out), np.asarray(ref)
    assert out_np.shape == ref_np.shape == (9, C_OUT, 9, 16), out_np.shape
    both_nan = np.isnan(out_np) & np.isnan(ref_np)
    close = np.isclose(out_np, ref_np, rtol=1e-2, atol=1e-2) | both_nan
    # pow(x, -0.5) amplifies fp noise near x ~ 0; allow a tiny mismatch fraction
    assert close.mean() > 0.999, f"mismatch fraction {1.0 - close.mean():.5f}"
    print("KERNEL_OK")
</pallas_src>

<mosaic_0001>
module attributes {stable_mosaic.version = 11 : i64} {
  func.func @kernel(%arg0: memref<9x36xf32, #tpu.memory_space<vmem>>, %arg1: memref<36x144xf32, #tpu.memory_space<vmem>>, %arg2: memref<9x1xf32, #tpu.memory_space<vmem>>, %arg3: memref<9x1xf32, #tpu.memory_space<vmem>>, %arg4: memref<9x1xf32, #tpu.memory_space<vmem>>, %arg5: memref<9x9x144xf32, #tpu.memory_space<vmem>>, %arg6: memref<9x9x16xf32, #tpu.memory_space<vmem>>, %arg7: memref<9x9x16xf32, #tpu.memory_space<vmem>>) attributes {dimension_semantics = [], scalar_prefetch = 0 : i64, scratch_operands = 2 : i64, tpu.core_type = #tpu.core_type<tc>} {
    %c0 = arith.constant 0 : index
    %c0_0 = arith.constant 0 : index
    %0 = vector.load %arg0[%c0, %c0_0] : memref<9x36xf32, #tpu.memory_space<vmem>>, vector<9x36xf32>
    %c0_1 = arith.constant 0 : index
    %c0_2 = arith.constant 0 : index
    %1 = vector.load %arg1[%c0_1, %c0_2] : memref<36x144xf32, #tpu.memory_space<vmem>>, vector<36x144xf32>
    %cst = arith.constant dense<0.000000e+00> : vector<9x144xf32>
    %2 = tpu.matmul %0, %1, %cst {dimension_numbers = #tpu.dot_dimension_numbers<[1], [0], [0], [1], [0, 0, 1, 1], [], []>} : vector<9x36xf32>, vector<36x144xf32>, vector<9x144xf32> -> vector<9x144xf32>
    %c0_3 = arith.constant 0 : index
    %c0_4 = arith.constant 0 : index
    %3 = vector.load %arg2[%c0_3, %c0_4] : memref<9x1xf32, #tpu.memory_space<vmem>>, vector<9x1xf32>
    %4 = vector.broadcast %3 : vector<9x1xf32> to vector<9x144xf32>
    %5 = arith.addf %2, %4 : vector<9x144xf32>
    %cst_5 = arith.constant dense<0.000000e+00> : vector<9xf32>
    %6 = vector.multi_reduction <add>, %5, %cst_5 [1] : vector<9x144xf32> to vector<9xf32>
    %7 = vector.shape_cast %6 : vector<9xf32> to vector<9x1xf32>
    %cst_6 = arith.constant 1.440000e+02 : f32
    %8 = vector.broadcast %cst_6 : f32 to vector<9x1xf32>
    %9 = arith.divf %7, %8 : vector<9x1xf32>
    %10 = vector.broadcast %9 : vector<9x1xf32> to vector<9x144xf32>
    %11 = arith.subf %5, %10 : vector<9x144xf32>
    %12 = arith.mulf %11, %11 : vector<9x144xf32>
    %cst_7 = arith.constant dense<0.000000e+00> : vector<9xf32>
    %13 = vector.multi_reduction <add>, %12, %cst_7 [1] : vector<9x144xf32> to vector<9xf32>
    %14 = vector.shape_cast %13 : vector<9xf32> to vector<9x1xf32>
    %cst_8 = arith.constant 1.440000e+02 : f32
    %15 = vector.broadcast %cst_8 : f32 to vector<9x1xf32>
    %16 = arith.divf %14, %15 : vector<9x1xf32>
    %17 = vector.broadcast %9 : vector<9x1xf32> to vector<9x144xf32>
    %18 = arith.subf %5, %17 : vector<9x144xf32>
    %cst_9 = arith.constant 9.99999974E-6 : f32
    %19 = vector.broadcast %cst_9 : f32 to vector<9x1xf32>
    %20 = arith.addf %16, %19 : vector<9x1xf32>
    %21 = math.rsqrt %20 : vector<9x1xf32>
    %22 = vector.broadcast %21 : vector<9x1xf32> to vector<9x144xf32>
    %23 = arith.mulf %18, %22 : vector<9x144xf32>
    %c0_10 = arith.constant 0 : index
    %c0_11 = arith.constant 0 : index
    %24 = vector.load %arg3[%c0_10, %c0_11] : memref<9x1xf32, #tpu.memory_space<vmem>>, vector<9x1xf32>
    %25 = vector.broadcast %24 : vector<9x1xf32> to vector<9x144xf32>
    %26 = arith.mulf %23, %25 : vector<9x144xf32>
    %c0_12 = arith.constant 0 : index
    %c0_13 = arith.constant 0 : index
    %27 = vector.load %arg4[%c0_12, %c0_13] : memref<9x1xf32, #tpu.memory_space<vmem>>, vector<9x1xf32>
    %28 = vector.broadcast %27 : vector<9x1xf32> to vector<9x144xf32>
    %29 = arith.addf %26, %28 : vector<9x144xf32>
    %cst_14 = arith.constant 4.471500e-02 : f32
    %30 = vector.broadcast %cst_14 : f32 to vector<9x144xf32>
    %31 = arith.mulf %30, %29 : vector<9x144xf32>
    %32 = arith.mulf %31, %29 : vector<9x144xf32>
    %33 = arith.mulf %32, %29 : vector<9x144xf32>
    %34 = arith.addf %29, %33 : vector<9x144xf32>
    %cst_15 = arith.constant 0.797884583 : f32
    %35 = vector.broadcast %cst_15 : f32 to vector<9x144xf32>
    %36 = arith.mulf %35, %34 : vector<9x144xf32>
    %cst_16 = arith.constant 5.000000e-01 : f32
    %37 = vector.broadcast %cst_16 : f32 to vector<9x144xf32>
    %38 = arith.mulf %37, %29 : vector<9x144xf32>
    %39 = math.tanh %36 : vector<9x144xf32>
    %cst_17 = arith.constant 1.000000e+00 : f32
    %40 = vector.broadcast %cst_17 : f32 to vector<9x144xf32>
    %41 = arith.addf %39, %40 : vector<9x144xf32>
    %42 = arith.mulf %38, %41 : vector<9x144xf32>
    %43 = math.rsqrt %42 : vector<9x144xf32>
    %cst_18 = arith.constant dense<0xFF800000> : vector<144xf32>
    %44 = vector.multi_reduction <maximumf>, %42, %cst_18 [0] : vector<9x144xf32> to vector<144xf32>
    %45 = vector.shape_cast %44 : vector<144xf32> to vector<1x144xf32>
    %46 = vector.broadcast %45 : vector<1x144xf32> to vector<9x144xf32>
    %47 = arith.subf %42, %46 : vector<9x144xf32>
    %48 = math.exp %47 : vector<9x144xf32>
    %cst_19 = arith.constant dense<0.000000e+00> : vector<144xf32>
    %49 = vector.multi_reduction <add>, %48, %cst_19 [0] : vector<9x144xf32> to vector<144xf32>
    %50 = vector.shape_cast %49 : vector<144xf32> to vector<1x144xf32>
    %51 = tpu.reciprocal %50 {approx = true} : vector<1x144xf32> -> vector<1x144xf32>
    %52 = vector.broadcast %51 : vector<1x144xf32> to vector<9x144xf32>
    %53 = arith.mulf %48, %52 : vector<9x144xf32>
    %54 = vector.extract_strided_slice %43 {offsets = [0, 0], sizes = [9, 16], strides = [1, 1]} : vector<9x144xf32> to vector<9x16xf32>
    %c0_20 = arith.constant 0 : index
    %c0_21 = arith.constant 0 : index
    %c0_22 = arith.constant 0 : index
    %55 = vector.load %arg6[%c0_20, %c0_21, %c0_22] : memref<9x9x16xf32, #tpu.memory_space<vmem>>, vector<1x9x16xf32>
    %56 = vector.shape_cast %55 : vector<1x9x16xf32> to vector<9x16xf32>
    %57 = vector.shape_cast %54 : vector<9x16xf32> to vector<1x9x16xf32>
    tpu.vector_store %arg6[%c0_20, %c0_21, %c0_22], %57 {strides = array<i32>} : memref<9x9x16xf32, #tpu.memory_space<vmem>>, vector<1x9x16xf32>,
    %58 = vector.extract_strided_slice %53 {offsets = [0, 0], sizes = [9, 16], strides = [1, 1]} : vector<9x144xf32> to vector<9x16xf32>
    %c0_23 = arith.constant 0 : index
    %c0_24 = arith.constant 0 : index
    %c0_25 = arith.constant 0 : index
    %59 = vector.load %arg7[%c0_23, %c0_24, %c0_25] : memref<9x9x16xf32, #tpu.memory_space<vmem>>, vector<1x9x16xf32>
    %60 = vector.shape_cast %59 : vector<1x9x16xf32> to vector<9x16xf32>
    %61 = vector.shape_cast %58 : vector<9x16xf32> to vector<1x9x16xf32>
    tpu.vector_store %arg7[%c0_23, %c0_24, %c0_25], %61 {strides = array<i32>} : memref<9x9x16xf32, #tpu.memory_space<vmem>>, vector<1x9x16xf32>,
    %62 = vector.extract_strided_slice %43 {offsets = [0, 16], sizes = [9, 16], strides = [1, 1]} : vector<9x144xf32> to vector<9x16xf32>
    %c1 = arith.constant 1 : index
    %c0_26 = arith.constant 0 : index
    %c0_27 = arith.constant 0 : index
    %63 = vector.load %arg6[%c1, %c0_26, %c0_27] : memref<9x9x16xf32, #tpu.memory_space<vmem>>, vector<1x9x16xf32>
    %64 = vector.shape_cast %63 : vector<1x9x16xf32> to vector<9x16xf32>
    %65 = vector.shape_cast %62 : vector<9x16xf32> to vector<1x9x16xf32>
    tpu.vector_store %arg6[%c1, %c0_26, %c0_27], %65 {strides = array<i32>} : memref<9x9x16xf32, #tpu.memory_space<vmem>>, vector<1x9x16xf32>,
    %66 = vector.extract_strided_slice %53 {offsets = [0, 16], sizes = [9, 16], strides = [1, 1]} : vector<9x144xf32> to vector<9x16xf32>
    %c1_28 = arith.constant 1 : index
    %c0_29 = arith.constant 0 : index
    %c0_30 = arith.constant 0 : index
    %67 = vector.load %arg7[%c1_28, %c0_29, %c0_30] : memref<9x9x16xf32, #tpu.memory_space<vmem>>, vector<1x9x16xf32>
    %68 = vector.shape_cast %67 : vector<1x9x16xf32> to vector<9x16xf32>
    %69 = vector.shape_cast %66 : vector<9x16xf32> to vector<1x9x16xf32>
    tpu.vector_store %arg7[%c1_28, %c0_29, %c0_30], %69 {strides = array<i32>} : memref<9x9x16xf32, #tpu.memory_space<vmem>>, vector<1x9x16xf32>,
    %70 = vector.extract_strided_slice %43 {offsets = [0, 32], sizes = [9, 16], strides = [1, 1]} : vector<9x144xf32> to vector<9x16xf32>
    %c2 = arith.constant 2 : index
    %c0_31 = arith.constant 0 : index
    %c0_32 = arith.constant 0 : index
    %71 = vector.load %arg6[%c2, %c0_31, %c0_32] : memref<9x9x16xf32, #tpu.memory_space<vmem>>, vector<1x9x16xf32>
    %72 = vector.shape_cast %71 : vector<1x9x16xf32> to vector<9x16xf32>
    %73 = vector.shape_cast %70 : vector<9x16xf32> to vector<1x9x16xf32>
    tpu.vector_store %arg6[%c2, %c0_31, %c0_32], %73 {strides = array<i32>} : memref<9x9x16xf32, #tpu.memory_space<vmem>>, vector<1x9x16xf32>,
    %74 = vector.extract_strided_slice %53 {offsets = [0, 32], sizes = [9, 16], strides = [1, 1]} : vector<9x144xf32> to vector<9x16xf32>
    %c2_33 = arith.constant 2 : index
    %c0_34 = arith.constant 0 : index
    %c0_35 = arith.constant 0 : index
    %75 = vector.load %arg7[%c2_33, %c0_34, %c0_35] : memref<9x9x16xf32, #tpu.memory_space<vmem>>, vector<1x9x16xf32>
    %76 = vector.shape_cast %75 : vector<1x9x16xf32> to vector<9x16xf32>
    %77 = vector.shape_cast %74 : vector<9x16xf32> to vector<1x9x16xf32>
    tpu.vector_store %arg7[%c2_33, %c0_34, %c0_35], %77 {strides = array<i32>} : memref<9x9x16xf32, #tpu.memory_space<vmem>>, vector<1x9x16xf32>,
    %78 = vector.extract_strided_slice %43 {offsets = [0, 48], sizes = [9, 16], strides = [1, 1]} : vector<9x144xf32> to vector<9x16xf32>
    %c3 = arith.constant 3 : index
    %c0_36 = arith.constant 0 : index
    %c0_37 = arith.constant 0 : index
    %79 = vector.load %arg6[%c3, %c0_36, %c0_37] : memref<9x9x16xf32, #tpu.memory_space<vmem>>, vector<1x9x16xf32>
    %80 = vector.shape_cast %79 : vector<1x9x16xf32> to vector<9x16xf32>
    %81 = vector.shape_cast %78 : vector<9x16xf32> to vector<1x9x16xf32>
    tpu.vector_store %arg6[%c3, %c0_36, %c0_37], %81 {strides = array<i32>} : memref<9x9x16xf32, #tpu.memory_space<vmem>>, vector<1x9x16xf32>,
    %82 = vector.extract_strided_slice %53 {offsets = [0, 48], sizes = [9, 16], strides = [1, 1]} : vector<9x144xf32> to vector<9x16xf32>
    %c3_38 = arith.constant 3 : index
    %c0_39 = arith.constant 0 : index
    %c0_40 = arith.constant 0 : index
    %83 = vector.load %arg7[%c3_38, %c0_39, %c0_40] : memref<9x9x16xf32, #tpu.memory_space<vmem>>, vector<1x9x16xf32>
    %84 = vector.shape_cast %83 : vector<1x9x16xf32> to vector<9x16xf32>
    %85 = vector.shape_cast %82 : vector<9x16xf32> to vector<1x9x16xf32>
    tpu.vector_store %arg7[%c3_38, %c0_39, %c0_40], %85 {strides = array<i32>} : memref<9x9x16xf32, #tpu.memory_space<vmem>>, vector<1x9x16xf32>,
    %86 = vector.extract_strided_slice %43 {offsets = [0, 64], sizes = [9, 16], strides = [1, 1]} : vector<9x144xf32> to vector<9x16xf32>
    %c4 = arith.constant 4 : index
    %c0_41 = arith.constant 0 : index
    %c0_42 = arith.constant 0 : index
    %87 = vector.load %arg6[%c4, %c0_41, %c0_42] : memref<9x9x16xf32, #tpu.memory_space<vmem>>, vector<1x9x16xf32>
    %88 = vector.shape_cast %87 : vector<1x9x16xf32> to vector<9x16xf32>
    %89 = vector.shape_cast %86 : vector<9x16xf32> to vector<1x9x16xf32>
    tpu.vector_store %arg6[%c4, %c0_41, %c0_42], %89 {strides = array<i32>} : memref<9x9x16xf32, #tpu.memory_space<vmem>>, vector<1x9x16xf32>,
    %90 = vector.extract_strided_slice %53 {offsets = [0, 64], sizes = [9, 16], strides = [1, 1]} : vector<9x144xf32> to vector<9x16xf32>
    %c4_43 = arith.constant 4 : index
    %c0_44 = arith.constant 0 : index
    %c0_45 = arith.constant 0 : index
    %91 = vector.load %arg7[%c4_43, %c0_44, %c0_45] : memref<9x9x16xf32, #tpu.memory_space<vmem>>, vector<1x9x16xf32>
    %92 = vector.shape_cast %91 : vector<1x9x16xf32> to vector<9x16xf32>
    %93 = vector.shape_cast %90 : vector<9x16xf32> to vector<1x9x16xf32>
    tpu.vector_store %arg7[%c4_43, %c0_44, %c0_45], %93 {strides = array<i32>} : memref<9x9x16xf32, #tpu.memory_space<vmem>>, vector<1x9x16xf32>,
    %94 = vector.extract_strided_slice %43 {offsets = [0, 80], sizes = [9, 16], strides = [1, 1]} : vector<9x144xf32> to vector<9x16xf32>
    %c5 = arith.constant 5 : index
    %c0_46 = arith.constant 0 : index
    %c0_47 = arith.constant 0 : index
    %95 = vector.load %arg6[%c5, %c0_46, %c0_47] : memref<9x9x16xf32, #tpu.memory_space<vmem>>, vector<1x9x16xf32>
    %96 = vector.shape_cast %95 : vector<1x9x16xf32> to vector<9x16xf32>
    %97 = vector.shape_cast %94 : vector<9x16xf32> to vector<1x9x16xf32>
    tpu.vector_store %arg6[%c5, %c0_46, %c0_47], %97 {strides = array<i32>} : memref<9x9x16xf32, #tpu.memory_space<vmem>>, vector<1x9x16xf32>,
    %98 = vector.extract_strided_slice %53 {offsets = [0, 80], sizes = [9, 16], strides = [1, 1]} : vector<9x144xf32> to vector<9x16xf32>
    %c5_48 = arith.constant 5 : index
    %c0_49 = arith.constant 0 : index
    %c0_50 = arith.constant 0 : index
    %99 = vector.load %arg7[%c5_48, %c0_49, %c0_50] : memref<9x9x16xf32, #tpu.memory_space<vmem>>, vector<1x9x16xf32>
    %100 = vector.shape_cast %99 : vector<1x9x16xf32> to vector<9x16xf32>
    %101 = vector.shape_cast %98 : vector<9x16xf32> to vector<1x9x16xf32>
    tpu.vector_store %arg7[%c5_48, %c0_49, %c0_50], %101 {strides = array<i32>} : memref<9x9x16xf32, #tpu.memory_space<vmem>>, vector<1x9x16xf32>,
    %102 = vector.extract_strided_slice %43 {offsets = [0, 96], sizes = [9, 16], strides = [1, 1]} : vector<9x144xf32> to vector<9x16xf32>
    %c6 = arith.constant 6 : index
    %c0_51 = arith.constant 0 : index
    %c0_52 = arith.constant 0 : index
    %103 = vector.load %arg6[%c6, %c0_51, %c0_52] : memref<9x9x16xf32, #tpu.memory_space<vmem>>, vector<1x9x16xf32>
    %104 = vector.shape_cast %103 : vector<1x9x16xf32> to vector<9x16xf32>
    %105 = vector.shape_cast %102 : vector<9x16xf32> to vector<1x9x16xf32>
    tpu.vector_store %arg6[%c6, %c0_51, %c0_52], %105 {strides = array<i32>} : memref<9x9x16xf32, #tpu.memory_space<vmem>>, vector<1x9x16xf32>,
    %106 = vector.extract_strided_slice %53 {offsets = [0, 96], sizes = [9, 16], strides = [1, 1]} : vector<9x144xf32> to vector<9x16xf32>
    %c6_53 = arith.constant 6 : index
    %c0_54 = arith.constant 0 : index
    %c0_55 = arith.constant 0 : index
    %107 = vector.load %arg7[%c6_53, %c0_54, %c0_55] : memref<9x9x16xf32, #tpu.memory_space<vmem>>, vector<1x9x16xf32>
    %108 = vector.shape_cast %107 : vector<1x9x16xf32> to vector<9x16xf32>
    %109 = vector.shape_cast %106 : vector<9x16xf32> to vector<1x9x16xf32>
    tpu.vector_store %arg7[%c6_53, %c0_54, %c0_55], %109 {strides = array<i32>} : memref<9x9x16xf32, #tpu.memory_space<vmem>>, vector<1x9x16xf32>,
    %110 = vector.extract_strided_slice %43 {offsets = [0, 112], sizes = [9, 16], strides = [1, 1]} : vector<9x144xf32> to vector<9x16xf32>
    %c7 = arith.constant 7 : index
    %c0_56 = arith.constant 0 : index
    %c0_57 = arith.constant 0 : index
    %111 = vector.load %arg6[%c7, %c0_56, %c0_57] : memref<9x9x16xf32, #tpu.memory_space<vmem>>, vector<1x9x16xf32>
    %112 = vector.shape_cast %111 : vector<1x9x16xf32> to vector<9x16xf32>
    %113 = vector.shape_cast %110 : vector<9x16xf32> to vector<1x9x16xf32>
    tpu.vector_store %arg6[%c7, %c0_56, %c0_57], %113 {strides = array<i32>} : memref<9x9x16xf32, #tpu.memory_space<vmem>>, vector<1x9x16xf32>,
    %114 = vector.extract_strided_slice %53 {offsets = [0, 112], sizes = [9, 16], strides = [1, 1]} : vector<9x144xf32> to vector<9x16xf32>
    %c7_58 = arith.constant 7 : index
    %c0_59 = arith.constant 0 : index
    %c0_60 = arith.constant 0 : index
    %115 = vector.load %arg7[%c7_58, %c0_59, %c0_60] : memref<9x9x16xf32, #tpu.memory_space<vmem>>, vector<1x9x16xf32>
    %116 = vector.shape_cast %115 : vector<1x9x16xf32> to vector<9x16xf32>
    %117 = vector.shape_cast %114 : vector<9x16xf32> to vector<1x9x16xf32>
    tpu.vector_store %arg7[%c7_58, %c0_59, %c0_60], %117 {strides = array<i32>} : memref<9x9x16xf32, #tpu.memory_space<vmem>>, vector<1x9x16xf32>,
    %118 = vector.extract_strided_slice %43 {offsets = [0, 128], sizes = [9, 16], strides = [1, 1]} : vector<9x144xf32> to vector<9x16xf32>
    %c8 = arith.constant 8 : index
    %c0_61 = arith.constant 0 : index
    %c0_62 = arith.constant 0 : index
    %119 = vector.load %arg6[%c8, %c0_61, %c0_62] : memref<9x9x16xf32, #tpu.memory_space<vmem>>, vector<1x9x16xf32>
    %120 = vector.shape_cast %119 : vector<1x9x16xf32> to vector<9x16xf32>
    %121 = vector.shape_cast %118 : vector<9x16xf32> to vector<1x9x16xf32>
    tpu.vector_store %arg6[%c8, %c0_61, %c0_62], %121 {strides = array<i32>} : memref<9x9x16xf32, #tpu.memory_space<vmem>>, vector<1x9x16xf32>,
    %122 = vector.extract_strided_slice %53 {offsets = [0, 128], sizes = [9, 16], strides = [1, 1]} : vector<9x144xf32> to vector<9x16xf32>
    %c8_63 = arith.constant 8 : index
    %c0_64 = arith.constant 0 : index
    %c0_65 = arith.constant 0 : index
    %123 = vector.load %arg7[%c8_63, %c0_64, %c0_65] : memref<9x9x16xf32, #tpu.memory_space<vmem>>, vector<1x9x16xf32>
    %124 = vector.shape_cast %123 : vector<1x9x16xf32> to vector<9x16xf32>
    %125 = vector.shape_cast %122 : vector<9x16xf32> to vector<1x9x16xf32>
    tpu.vector_store %arg7[%c8_63, %c0_64, %c0_65], %125 {strides = array<i32>} : memref<9x9x16xf32, #tpu.memory_space<vmem>>, vector<1x9x16xf32>,
    %c0_66 = arith.constant 0 : index
    %c0_67 = arith.constant 0 : index
    %c0_68 = arith.constant 0 : index
    %126 = vector.load %arg6[%c0_66, %c0_67, %c0_68] : memref<9x9x16xf32, #tpu.memory_space<vmem>>, vector<9x1x16xf32>
    %127 = vector.shape_cast %126 : vector<9x1x16xf32> to vector<9x16xf32>
    %c0_69 = arith.constant 0 : index
    %c1_70 = arith.constant 1 : index
    %c0_71 = arith.constant 0 : index
    %128 = vector.load %arg6[%c0_69, %c1_70, %c0_71] : memref<9x9x16xf32, #tpu.memory_space<vmem>>, vector<9x1x16xf32>
    %129 = vector.shape_cast %128 : vector<9x1x16xf32> to vector<9x16xf32>
    %c0_72 = arith.constant 0 : index
    %c2_73 = arith.constant 2 : index
    %c0_74 = arith.constant 0 : index
    %130 = vector.load %arg6[%c0_72, %c2_73, %c0_74] : memref<9x9x16xf32, #tpu.memory_space<vmem>>, vector<9x1x16xf32>
    %131 = vector.shape_cast %130 : vector<9x1x16xf32> to vector<9x16xf32>
    %c0_75 = arith.constant 0 : index
    %c3_76 = arith.constant 3 : index
    %c0_77 = arith.constant 0 : index
    %132 = vector.load %arg6[%c0_75, %c3_76, %c0_77] : memref<9x9x16xf32, #tpu.memory_space<vmem>>, vector<9x1x16xf32>
    %133 = vector.shape_cast %132 : vector<9x1x16xf32> to vector<9x16xf32>
    %c0_78 = arith.constant 0 : index
    %c4_79 = arith.constant 4 : index
    %c0_80 = arith.constant 0 : index
    %134 = vector.load %arg6[%c0_78, %c4_79, %c0_80] : memref<9x9x16xf32, #tpu.memory_space<vmem>>, vector<9x1x16xf32>
    %135 = vector.shape_cast %134 : vector<9x1x16xf32> to vector<9x16xf32>
    %c0_81 = arith.constant 0 : index
    %c5_82 = arith.constant 5 : index
    %c0_83 = arith.constant 0 : index
    %136 = vector.load %arg6[%c0_81, %c5_82, %c0_83] : memref<9x9x16xf32, #tpu.memory_space<vmem>>, vector<9x1x16xf32>
    %137 = vector.shape_cast %136 : vector<9x1x16xf32> to vector<9x16xf32>
    %c0_84 = arith.constant 0 : index
    %c6_85 = arith.constant 6 : index
    %c0_86 = arith.constant 0 : index
    %138 = vector.load %arg6[%c0_84, %c6_85, %c0_86] : memref<9x9x16xf32, #tpu.memory_space<vmem>>, vector<9x1x16xf32>
    %139 = vector.shape_cast %138 : vector<9x1x16xf32> to vector<9x16xf32>
    %c0_87 = arith.constant 0 : index
    %c7_88 = arith.constant 7 : index
    %c0_89 = arith.constant 0 : index
    %140 = vector.load %arg6[%c0_87, %c7_88, %c0_89] : memref<9x9x16xf32, #tpu.memory_space<vmem>>, vector<9x1x16xf32>
    %141 = vector.shape_cast %140 : vector<9x1x16xf32> to vector<9x16xf32>
    %c0_90 = arith.constant 0 : index
    %c8_91 = arith.constant 8 : index
    %c0_92 = arith.constant 0 : index
    %142 = vector.load %arg6[%c0_90, %c8_91, %c0_92] : memref<9x9x16xf32, #tpu.memory_space<vmem>>, vector<9x1x16xf32>
    %143 = vector.shape_cast %142 : vector<9x1x16xf32> to vector<9x16xf32>
    %144 = tpu.concatenate %127, %129, %131, %133, %135, %137, %139, %141, %143 in 1 : vector<9x16xf32>, vector<9x16xf32>, vector<9x16xf32>, vector<9x16xf32>, vector<9x16xf32>, vector<9x16xf32>, vector<9x16xf32>, vector<9x16xf32>, vector<9x16xf32> -> vector<9x144xf32>
    %c0_93 = arith.constant 0 : index
    %c0_94 = arith.constant 0 : index
    %c0_95 = arith.constant 0 : index
    %145 = vector.load %arg7[%c0_93, %c0_94, %c0_95] : memref<9x9x16xf32, #tpu.memory_space<vmem>>, vector<9x1x16xf32>
    %146 = vector.shape_cast %145 : vector<9x1x16xf32> to vector<9x16xf32>
    %c0_96 = arith.constant 0 : index
    %c1_97 = arith.constant 1 : index
    %c0_98 = arith.constant 0 : index
    %147 = vector.load %arg7[%c0_96, %c1_97, %c0_98] : memref<9x9x16xf32, #tpu.memory_space<vmem>>, vector<9x1x16xf32>
    %148 = vector.shape_cast %147 : vector<9x1x16xf32> to vector<9x16xf32>
    %c0_99 = arith.constant 0 : index
    %c2_100 = arith.constant 2 : index
    %c0_101 = arith.constant 0 : index
    %149 = vector.load %arg7[%c0_99, %c2_100, %c0_101] : memref<9x9x16xf32, #tpu.memory_space<vmem>>, vector<9x1x16xf32>
    %150 = vector.shape_cast %149 : vector<9x1x16xf32> to vector<9x16xf32>
    %c0_102 = arith.constant 0 : index
    %c3_103 = arith.constant 3 : index
    %c0_104 = arith.constant 0 : index
    %151 = vector.load %arg7[%c0_102, %c3_103, %c0_104] : memref<9x9x16xf32, #tpu.memory_space<vmem>>, vector<9x1x16xf32>
    %152 = vector.shape_cast %151 : vector<9x1x16xf32> to vector<9x16xf32>
    %c0_105 = arith.constant 0 : index
    %c4_106 = arith.constant 4 : index
    %c0_107 = arith.constant 0 : index
    %153 = vector.load %arg7[%c0_105, %c4_106, %c0_107] : memref<9x9x16xf32, #tpu.memory_space<vmem>>, vector<9x1x16xf32>
    %154 = vector.shape_cast %153 : vector<9x1x16xf32> to vector<9x16xf32>
    %c0_108 = arith.constant 0 : index
    %c5_109 = arith.constant 5 : index
    %c0_110 = arith.constant 0 : index
    %155 = vector.load %arg7[%c0_108, %c5_109, %c0_110] : memref<9x9x16xf32, #tpu.memory_space<vmem>>, vector<9x1x16xf32>
    %156 = vector.shape_cast %155 : vector<9x1x16xf32> to vector<9x16xf32>
    %c0_111 = arith.constant 0 : index
    %c6_112 = arith.constant 6 : index
    %c0_113 = arith.constant 0 : index
    %157 = vector.load %arg7[%c0_111, %c6_112, %c0_113] : memref<9x9x16xf32, #tpu.memory_space<vmem>>, vector<9x1x16xf32>
    %158 = vector.shape_cast %157 : vector<9x1x16xf32> to vector<9x16xf32>
    %c0_114 = arith.constant 0 : index
    %c7_115 = arith.constant 7 : index
    %c0_116 = arith.constant 0 : index
    %159 = vector.load %arg7[%c0_114, %c7_115, %c0_116] : memref<9x9x16xf32, #tpu.memory_space<vmem>>, vector<9x1x16xf32>
    %160 = vector.shape_cast %159 : vector<9x1x16xf32> to vector<9x16xf32>
    %c0_117 = arith.constant 0 : index
    %c8_118 = arith.constant 8 : index
    %c0_119 = arith.constant 0 : index
    %161 = vector.load %arg7[%c0_117, %c8_118, %c0_119] : memref<9x9x16xf32, #tpu.memory_space<vmem>>, vector<9x1x16xf32>
    %162 = vector.shape_cast %161 : vector<9x1x16xf32> to vector<9x16xf32>
    %163 = tpu.concatenate %146, %148, %150, %152, %154, %156, %158, %160, %162 in 1 : vector<9x16xf32>, vector<9x16xf32>, vector<9x16xf32>, vector<9x16xf32>, vector<9x16xf32>, vector<9x16xf32>, vector<9x16xf32>, vector<9x16xf32>, vector<9x16xf32> -> vector<9x144xf32>
    %164 = vector.extract_strided_slice %53 {offsets = [0, 0], sizes = [9, 16], strides = [1, 1]} : vector<9x144xf32> to vector<9x16xf32>
    %165 = tpu.concatenate %164, %164, %164, %164, %164, %164, %164, %164, %164 in 1 : vector<9x16xf32>, vector<9x16xf32>, vector<9x16xf32>, vector<9x16xf32>, vector<9x16xf32>, vector<9x16xf32>, vector<9x16xf32>, vector<9x16xf32>, vector<9x16xf32> -> vector<9x144xf32>
    %166 = arith.addf %43, %165 : vector<9x144xf32>
    %167 = vector.extract_strided_slice %163 {offsets = [0, 0], sizes = [1, 144], strides = [1, 1]} : vector<9x144xf32> to vector<1x144xf32>
    %168 = vector.broadcast %167 : vector<1x144xf32> to vector<9x144xf32>
    %169 = arith.mulf %144, %168 : vector<9x144xf32>
    %cst_120 = arith.constant 0.000000e+00 : f32
    %170 = vector.broadcast %cst_120 : f32 to vector<9x144xf32>
    %171 = arith.maximumf %169, %170 : vector<9x144xf32>
    %172 = arith.mulf %166, %171 : vector<9x144xf32>
    %c0_121 = arith.constant 0 : index
    %c0_122 = arith.constant 0 : index
    %c0_123 = arith.constant 0 : index
    %173 = vector.load %arg5[%c0_121, %c0_122, %c0_123] : memref<9x9x144xf32, #tpu.memory_space<vmem>>, vector<1x9x144xf32>
    %174 = vector.shape_cast %173 : vector<1x9x144xf32> to vector<9x144xf32>
    %175 = vector.shape_cast %172 : vector<9x144xf32> to vector<1x9x144xf32>
    tpu.vector_store %arg5[%c0_121, %c0_122, %c0_123], %175 {strides = array<i32>} : memref<9x9x144xf32, #tpu.memory_space<vmem>>, vector<1x9x144xf32>,
    %176 = vector.extract_strided_slice %53 {offsets = [0, 16], sizes = [9, 16], strides = [1, 1]} : vector<9x144xf32> to vector<9x16xf32>
    %177 = tpu.concatenate %176, %176, %176, %176, %176, %176, %176, %176, %176 in 1 : vector<9x16xf32>, vector<9x16xf32>, vector<9x16xf32>, vector<9x16xf32>, vector<9x16xf32>, vector<9x16xf32>, vector<9x16xf32>, vector<9x16xf32>, vector<9x16xf32> -> vector<9x144xf32>
    %178 = arith.addf %43, %177 : vector<9x144xf32>
    %179 = vector.extract_strided_slice %163 {offsets = [1, 0], sizes = [1, 144], strides = [1, 1]} : vector<9x144xf32> to vector<1x144xf32>
    %180 = vector.broadcast %179 : vector<1x144xf32> to vector<9x144xf32>
    %181 = arith.mulf %144, %180 : vector<9x144xf32>
    %cst_124 = arith.constant 0.000000e+00 : f32
    %182 = vector.broadcast %cst_124 : f32 to vector<9x144xf32>
    %183 = arith.maximumf %181, %182 : vector<9x144xf32>
    %184 = arith.mulf %178, %183 : vector<9x144xf32>
    %c1_125 = arith.constant 1 : index
    %c0_126 = arith.constant 0 : index
    %c0_127 = arith.constant 0 : index
    %185 = vector.load %arg5[%c1_125, %c0_126, %c0_127] : memref<9x9x144xf32, #tpu.memory_space<vmem>>, vector<1x9x144xf32>
    %186 = vector.shape_cast %185 : vector<1x9x144xf32> to vector<9x144xf32>
    %187 = vector.shape_cast %184 : vector<9x144xf32> to vector<1x9x144xf32>
    tpu.vector_store %arg5[%c1_125, %c0_126, %c0_127], %187 {strides = array<i32>} : memref<9x9x144xf32, #tpu.memory_space<vmem>>, vector<1x9x144xf32>,
    %188 = vector.extract_strided_slice %53 {offsets = [0, 32], sizes = [9, 16], strides = [1, 1]} : vector<9x144xf32> to vector<9x16xf32>
    %189 = tpu.concatenate %188, %188, %188, %188, %188, %188, %188, %188, %188 in 1 : vector<9x16xf32>, vector<9x16xf32>, vector<9x16xf32>, vector<9x16xf32>, vector<9x16xf32>, vector<9x16xf32>, vector<9x16xf32>, vector<9x16xf32>, vector<9x16xf32> -> vector<9x144xf32>
    %190 = arith.addf %43, %189 : vector<9x144xf32>
    %191 = vector.extract_strided_slice %163 {offsets = [2, 0], sizes = [1, 144], strides = [1, 1]} : vector<9x144xf32> to vector<1x144xf32>
    %192 = vector.broadcast %191 : vector<1x144xf32> to vector<9x144xf32>
    %193 = arith.mulf %144, %192 : vector<9x144xf32>
    %cst_128 = arith.constant 0.000000e+00 : f32
    %194 = vector.broadcast %cst_128 : f32 to vector<9x144xf32>
    %195 = arith.maximumf %193, %194 : vector<9x144xf32>
    %196 = arith.mulf %190, %195 : vector<9x144xf32>
    %c2_129 = arith.constant 2 : index
    %c0_130 = arith.constant 0 : index
    %c0_131 = arith.constant 0 : index
    %197 = vector.load %arg5[%c2_129, %c0_130, %c0_131] : memref<9x9x144xf32, #tpu.memory_space<vmem>>, vector<1x9x144xf32>
    %198 = vector.shape_cast %197 : vector<1x9x144xf32> to vector<9x144xf32>
    %199 = vector.shape_cast %196 : vector<9x144xf32> to vector<1x9x144xf32>
    tpu.vector_store %arg5[%c2_129, %c0_130, %c0_131], %199 {strides = array<i32>} : memref<9x9x144xf32, #tpu.memory_space<vmem>>, vector<1x9x144xf32>,
    %200 = vector.extract_strided_slice %53 {offsets = [0, 48], sizes = [9, 16], strides = [1, 1]} : vector<9x144xf32> to vector<9x16xf32>
    %201 = tpu.concatenate %200, %200, %200, %200, %200, %200, %200, %200, %200 in 1 : vector<9x16xf32>, vector<9x16xf32>, vector<9x16xf32>, vector<9x16xf32>, vector<9x16xf32>, vector<9x16xf32>, vector<9x16xf32>, vector<9x16xf32>, vector<9x16xf32> -> vector<9x144xf32>
    %202 = arith.addf %43, %201 : vector<9x144xf32>
    %203 = vector.extract_strided_slice %163 {offsets = [3, 0], sizes = [1, 144], strides = [1, 1]} : vector<9x144xf32> to vector<1x144xf32>
    %204 = vector.broadcast %203 : vector<1x144xf32> to vector<9x144xf32>
    %205 = arith.mulf %144, %204 : vector<9x144xf32>
    %cst_132 = arith.constant 0.000000e+00 : f32
    %206 = vector.broadcast %cst_132 : f32 to vector<9x144xf32>
    %207 = arith.maximumf %205, %206 : vector<9x144xf32>
    %208 = arith.mulf %202, %207 : vector<9x144xf32>
    %c3_133 = arith.constant 3 : index
    %c0_134 = arith.constant 0 : index
    %c0_135 = arith.constant 0 : index
    %209 = vector.load %arg5[%c3_133, %c0_134, %c0_135] : memref<9x9x144xf32, #tpu.memory_space<vmem>>, vector<1x9x144xf32>
    %210 = vector.shape_cast %209 : vector<1x9x144xf32> to vector<9x144xf32>
    %211 = vector.shape_cast %208 : vector<9x144xf32> to vector<1x9x144xf32>
    tpu.vector_store %arg5[%c3_133, %c0_134, %c0_135], %211 {strides = array<i32>} : memref<9x9x144xf32, #tpu.memory_space<vmem>>, vector<1x9x144xf32>,
    %212 = vector.extract_strided_slice %53 {offsets = [0, 64], sizes = [9, 16], strides = [1, 1]} : vector<9x144xf32> to vector<9x16xf32>
    %213 = tpu.concatenate %212, %212, %212, %212, %212, %212, %212, %212, %212 in 1 : vector<9x16xf32>, vector<9x16xf32>, vector<9x16xf32>, vector<9x16xf32>, vector<9x16xf32>, vector<9x16xf32>, vector<9x16xf32>, vector<9x16xf32>, vector<9x16xf32> -> vector<9x144xf32>
    %214 = arith.addf %43, %213 : vector<9x144xf32>
    %215 = vector.extract_strided_slice %163 {offsets = [4, 0], sizes = [1, 144], strides = [1, 1]} : vector<9x144xf32> to vector<1x144xf32>
    %216 = vector.broadcast %215 : vector<1x144xf32> to vector<9x144xf32>
    %217 = arith.mulf %144, %216 : vector<9x144xf32>
    %cst_136 = arith.constant 0.000000e+00 : f32
    %218 = vector.broadcast %cst_136 : f32 to vector<9x144xf32>
    %219 = arith.maximumf %217, %218 : vector<9x144xf32>
    %220 = arith.mulf %214, %219 : vector<9x144xf32>
    %c4_137 = arith.constant 4 : index
    %c0_138 = arith.constant 0 : index
    %c0_139 = arith.constant 0 : index
    %221 = vector.load %arg5[%c4_137, %c0_138, %c0_139] : memref<9x9x144xf32, #tpu.memory_space<vmem>>, vector<1x9x144xf32>
    %222 = vector.shape_cast %221 : vector<1x9x144xf32> to vector<9x144xf32>
    %223 = vector.shape_cast %220 : vector<9x144xf32> to vector<1x9x144xf32>
    tpu.vector_store %arg5[%c4_137, %c0_138, %c0_139], %223 {strides = array<i32>} : memref<9x9x144xf32, #tpu.memory_space<vmem>>, vector<1x9x144xf32>,
    %224 = vector.extract_strided_slice %53 {offsets = [0, 80], sizes = [9, 16], strides = [1, 1]} : vector<9x144xf32> to vector<9x16xf32>
    %225 = tpu.concatenate %224, %224, %224, %224, %224, %224, %224, %224, %224 in 1 : vector<9x16xf32>, vector<9x16xf32>, vector<9x16xf32>, vector<9x16xf32>, vector<9x16xf32>, vector<9x16xf32>, vector<9x16xf32>, vector<9x16xf32>, vector<9x16xf32> -> vector<9x144xf32>
    %226 = arith.addf %43, %225 : vector<9x144xf32>
    %227 = vector.extract_strided_slice %163 {offsets = [5, 0], sizes = [1, 144], strides = [1, 1]} : vector<9x144xf32> to vector<1x144xf32>
    %228 = vector.broadcast %227 : vector<1x144xf32> to vector<9x144xf32>
    %229 = arith.mulf %144, %228 : vector<9x144xf32>
    %cst_140 = arith.constant 0.000000e+00 : f32
    %230 = vector.broadcast %cst_140 : f32 to vector<9x144xf32>
    %231 = arith.maximumf %229, %230 : vector<9x144xf32>
    %232 = arith.mulf %226, %231 : vector<9x144xf32>
    %c5_141 = arith.constant 5 : index
    %c0_142 = arith.constant 0 : index
    %c0_143 = arith.constant 0 : index
    %233 = vector.load %arg5[%c5_141, %c0_142, %c0_143] : memref<9x9x144xf32, #tpu.memory_space<vmem>>, vector<1x9x144xf32>
    %234 = vector.shape_cast %233 : vector<1x9x144xf32> to vector<9x144xf32>
    %235 = vector.shape_cast %232 : vector<9x144xf32> to vector<1x9x144xf32>
    tpu.vector_store %arg5[%c5_141, %c0_142, %c0_143], %235 {strides = array<i32>} : memref<9x9x144xf32, #tpu.memory_space<vmem>>, vector<1x9x144xf32>,
    %236 = vector.extract_strided_slice %53 {offsets = [0, 96], sizes = [9, 16], strides = [1, 1]} : vector<9x144xf32> to vector<9x16xf32>
    %237 = tpu.concatenate %236, %236, %236, %236, %236, %236, %236, %236, %236 in 1 : vector<9x16xf32>, vector<9x16xf32>, vector<9x16xf32>, vector<9x16xf32>, vector<9x16xf32>, vector<9x16xf32>, vector<9x16xf32>, vector<9x16xf32>, vector<9x16xf32> -> vector<9x144xf32>
    %238 = arith.addf %43, %237 : vector<9x144xf32>
    %239 = vector.extract_strided_slice %163 {offsets = [6, 0], sizes = [1, 144], strides = [1, 1]} : vector<9x144xf32> to vector<1x144xf32>
    %240 = vector.broadcast %239 : vector<1x144xf32> to vector<9x144xf32>
    %241 = arith.mulf %144, %240 : vector<9x144xf32>
    %cst_144 = arith.constant 0.000000e+00 : f32
    %242 = vector.broadcast %cst_144 : f32 to vector<9x144xf32>
    %243 = arith.maximumf %241, %242 : vector<9x144xf32>
    %244 = arith.mulf %238, %243 : vector<9x144xf32>
    %c6_145 = arith.constant 6 : index
    %c0_146 = arith.constant 0 : index
    %c0_147 = arith.constant 0 : index
    %245 = vector.load %arg5[%c6_145, %c0_146, %c0_147] : memref<9x9x144xf32, #tpu.memory_space<vmem>>, vector<1x9x144xf32>
    %246 = vector.shape_cast %245 : vector<1x9x144xf32> to vector<9x144xf32>
    %247 = vector.shape_cast %244 : vector<9x144xf32> to vector<1x9x144xf32>
    tpu.vector_store %arg5[%c6_145, %c0_146, %c0_147], %247 {strides = array<i32>} : memref<9x9x144xf32, #tpu.memory_space<vmem>>, vector<1x9x144xf32>,
    %248 = vector.extract_strided_slice %53 {offsets = [0, 112], sizes = [9, 16], strides = [1, 1]} : vector<9x144xf32> to vector<9x16xf32>
    %249 = tpu.concatenate %248, %248, %248, %248, %248, %248, %248, %248, %248 in 1 : vector<9x16xf32>, vector<9x16xf32>, vector<9x16xf32>, vector<9x16xf32>, vector<9x16xf32>, vector<9x16xf32>, vector<9x16xf32>, vector<9x16xf32>, vector<9x16xf32> -> vector<9x144xf32>
    %250 = arith.addf %43, %249 : vector<9x144xf32>
    %251 = vector.extract_strided_slice %163 {offsets = [7, 0], sizes = [1, 144], strides = [1, 1]} : vector<9x144xf32> to vector<1x144xf32>
    %252 = vector.broadcast %251 : vector<1x144xf32> to vector<9x144xf32>
    %253 = arith.mulf %144, %252 : vector<9x144xf32>
    %cst_148 = arith.constant 0.000000e+00 : f32
    %254 = vector.broadcast %cst_148 : f32 to vector<9x144xf32>
    %255 = arith.maximumf %253, %254 : vector<9x144xf32>
    %256 = arith.mulf %250, %255 : vector<9x144xf32>
    %c7_149 = arith.constant 7 : index
    %c0_150 = arith.constant 0 : index
    %c0_151 = arith.constant 0 : index
    %257 = vector.load %arg5[%c7_149, %c0_150, %c0_151] : memref<9x9x144xf32, #tpu.memory_space<vmem>>, vector<1x9x144xf32>
    %258 = vector.shape_cast %257 : vector<1x9x144xf32> to vector<9x144xf32>
    %259 = vector.shape_cast %256 : vector<9x144xf32> to vector<1x9x144xf32>
    tpu.vector_store %arg5[%c7_149, %c0_150, %c0_151], %259 {strides = array<i32>} : memref<9x9x144xf32, #tpu.memory_space<vmem>>, vector<1x9x144xf32>,
    %260 = vector.extract_strided_slice %53 {offsets = [0, 128], sizes = [9, 16], strides = [1, 1]} : vector<9x144xf32> to vector<9x16xf32>
    %261 = tpu.concatenate %260, %260, %260, %260, %260, %260, %260, %260, %260 in 1 : vector<9x16xf32>, vector<9x16xf32>, vector<9x16xf32>, vector<9x16xf32>, vector<9x16xf32>, vector<9x16xf32>, vector<9x16xf32>, vector<9x16xf32>, vector<9x16xf32> -> vector<9x144xf32>
    %262 = arith.addf %43, %261 : vector<9x144xf32>
    %263 = vector.extract_strided_slice %163 {offsets = [8, 0], sizes = [1, 144], strides = [1, 1]} : vector<9x144xf32> to vector<1x144xf32>
    %264 = vector.broadcast %263 : vector<1x144xf32> to vector<9x144xf32>
    %265 = arith.mulf %144, %264 : vector<9x144xf32>
    %cst_152 = arith.constant 0.000000e+00 : f32
    %266 = vector.broadcast %cst_152 : f32 to vector<9x144xf32>
    %267 = arith.maximumf %265, %266 : vector<9x144xf32>
    %268 = arith.mulf %262, %267 : vector<9x144xf32>
    %c8_153 = arith.constant 8 : index
    %c0_154 = arith.constant 0 : index
    %c0_155 = arith.constant 0 : index
    %269 = vector.load %arg5[%c8_153, %c0_154, %c0_155] : memref<9x9x144xf32, #tpu.memory_space<vmem>>, vector<1x9x144xf32>
    %270 = vector.shape_cast %269 : vector<1x9x144xf32> to vector<9x144xf32>
    %271 = vector.shape_cast %268 : vector<9x144xf32> to vector<1x9x144xf32>
    tpu.vector_store %arg5[%c8_153, %c0_154, %c0_155], %271 {strides = array<i32>} : memref<9x9x144xf32, #tpu.memory_space<vmem>>, vector<1x9x144xf32>,
    return
  }
}

</mosaic_0001>

<bundles_post_ra>
// kernel: model_forward.1
= control target key start
LH: loop header
LB: loop body
LE: loop exit
PB: predicated region body
PF: predicated region fallthrough
CT: control target
= control target key end

     0   :  { %v1679_v3 = vmov 0.0   ;;  %v1680_v8 = vmov 0   ;;  %vm51_vm0 = vcmask 1043456   ;;  %vm44_vm1 = vcmask 293888   ;;  %s1682_s25 = smov 112   ;;  %s1683_s26 = smov 64   ;;  %s2840_s1 = inlined_call_operand.vmem [shape: f32[36,144], index: 1, kind: input, shape index: {}]   ;;  %s2841_s2 = inlined_call_operand.vmem [shape: f32[9,1], index: 2, kind: input, shape index: {}]   ;;  %s2842_s0 = inlined_call_operand.vmem [shape: f32[9,36], index: 0, kind: input, shape index: {}]   ;;  %s2843_s3 = inlined_call_operand.vmem [shape: f32[9,1], index: 3, kind: input, shape index: {}]   ;;  %s2844_s4 = inlined_call_operand.vmem [shape: f32[9,1], index: 4, kind: input, shape index: {}]   ;;  %s2845_s5 = inlined_call_operand.vmem [shape: f32[9,9,144], index: 5, kind: output, shape index: {}]  }
   0x1   :  { %v23_v0 = vld [vmem:[%s2840_s1 + $0x8] sm:$0xff]  ;;  %v25_v1 = vld [vmem:[%s2840_s1 + $0x18] sm:$0xff]  ;;  %v22_v2 = vld [vmem:[%s2840_s1] sm:$0xff]  ;;  %122 = vmatprep.mubr.f32.mxu0 %v1679_v3  ;;  %128 = vmatprep.mubr.f32.mxu1 %v1679_v3  ;;  %vm140_vm2 = vcmask 1040384   ;;  %vm142_vm3 = vcmask 122880   ;;  %vm135_vm4 = vcmask 130048  }
   0x2   :  { %v1621_v4 = vpack.c.bf16 %v25_v1, %v23_v0  ;;  %v24_v5 = vld [vmem:[%s2840_s1 + $0x10] sm:$0xff]  ;;  %v27_v6 = vld [vmem:[%s2840_s1 + $0x28] sm:$0xff]  ;;  %v29_v7 = vld [vmem:[%s2840_s1 + $0x38] sm:$0xff]  ;;  %1644 = vset.pattern.permute.xlu0 %v1680_v8  ;;  %1645 = vset.pattern.permute.xlu1 %v1680_v8  ;;  %s1684_s27 = smov 96   ;;  %s1685_s28 = smov 48   ;;  %vm532_vm5 = vcmask 1041409  }
   0x3   :  { %v1623_v9 = vpack.c.bf16 %v24_v5, %v22_v2  ;;  %v1625_v10 = vpack.c.bf16 %v29_v7, %v27_v6  ;;  %v26_v11 = vld [vmem:[%s2840_s1 + $0x20] sm:$0xff]  ;;  %v28_v12 = vld [vmem:[%s2840_s1 + $0x30] sm:$0xff]  ;;  %v33_v14 = vld [vmem:[%s2841_s2 + $0x8] sm:$0x1]  ;;  %s1686_s29 = smov 16   ;;  %s1687_s30 = smov 32  }
   0x4   :  { %1622 = vmatprep.subr.bf16.mxu0 %v1621_v4  ;;  %1629 = vmatprep.subr.bf16.mxu1 %v1621_v4  ;;  %v1627_v13 = vpack.c.bf16 %v28_v12, %v26_v11  ;;  %v31_v15 = vld [vmem:[%s2840_s1 + $0x48] sm:$0xf]  ;;  %v32_v16 = vld [vmem:[%s2841_s2] sm:$0xff]  ;;  %vm784_vm6 = vcmask 261120   ;;  %vm535_vm7 = vcmask 1042434   ;;  %vm538_vm8 = vcmask 1043459  }
   0x5   :  { %1624 = vmatpush1.bf16.msra.mxu0 %v1623_v9  ;;  %1632 = vmatpush1.bf16.msra.mxu1 %v1623_v9  ;;  %v30_v17 = vld [vmem:[%s2840_s1 + $0x40] sm:$0xf]  ;;  %v21_v19 = vld [vmem:[%s2842_s0 + $0x8] sm:$0x1]  ;;  %vm787_vm9 = vcmask 392192   ;;  %vm541_vm10 = vcmask 1044484  }
   0x6   :  { %1626 = vmatprep.subr.bf16.mxu0 %v1625_v10  ;;  %1630 = vmatprep.subr.bf16.mxu1 %v1625_v10  ;;  %v20_v18 = vld [vmem:[%s2842_s0] sm:$0xff]  ;;  %v178_v35 = vld [vmem:[%s2843_s3 + $0x8] sm:$0x1]  ;;  %vm544_vm11 = vcmask 1045509   ;;  %vm547_vm12 = vcmask 1046534   ;;  %vm550_vm13 = vcmask 1047559  }
   0x7   :  { %41 = vperm.xlu0 %1644, %v33_v14   ;;  %v177_v36 = vld [vmem:[%s2843_s3] sm:$0xff]  ;;  %v194_v37 = vld [vmem:[%s2844_s4 + $0x8] sm:$0x1]  ;;  %vm790_vm14 = vcmask 523264   ;;  %vm793_vm15 = vcmask 654336  }
   0x8   :  { %v193_v55 = vld [vmem:[%s2844_s4] sm:$0xff]  ;;  %s1681_s4 = smov 80  }
   0x9   :  { %1628 = vmatpush1.bf16.msra.mxu0 %v1627_v13  ;;  %1633 = vmatpush1.bf16.msra.mxu1 %v1627_v13 }
   0xa   :  { %1584 = vmatprep.subr.msk.mxu0 %vm51_vm0, %v31_v15  ;;  %1631 = vmatprep.subr.msk.mxu1 %vm51_vm0, %v31_v15 }
   0xb   :  { %36 = vperm.xlu0 %1644, %v32_v16  }
   0xd   :  { %1585 = vmatpush1.msk.msra.mxu0 %vm51_vm0, %v30_v17  ;;  %1634 = vmatpush1.msk.msra.mxu1 %vm51_vm0, %v30_v17  ;;  %vm796_vm0 = vcmask 785408  }
   0xe   :  { %1586 = vmatmul.mubr.msk.f32.vlgmr.msra.gmra.mrb[0].mxu0 %vm44_vm1, %v20_v18  ;;  %1587 = vmatmul.mubr.msk.f32.vlgmr.msra.gmra.mrb[0].mxu1 %vm44_vm1, %v21_v19  ;;  %vm799_vm1 = vcmask 916480  }
  0x86   :  { %v42_v20 = vpop.permute.xlu0 %41 }
  0x8a   :  { %v37_v21 = vpop.permute.xlu0 %36 }
  0xe1   :  { %v124_v22 = vpop.f32.mrb[0].mxu0  ;;  %v130_v23 = vpop.f32.mrb[0].mxu1 }
  0xe2   :  { %v131_v24 = vadd.f32 %v130_v23, %v42_v20  ;;  %v126_v25 = vpop.f32.mrb[1].mxu0  ;;  %v132_v26 = vpop.f32.mrb[1].mxu1  ;;  %v125_v31 = vadd.f32 %v124_v22, %v37_v21 }
  0xe3   :  { %v127_v27 = vadd.f32 %v126_v25, %v37_v21  ;;  %v133_v28 = vadd.f32 %v132_v26, %v42_v20 }
  0xe4   :  { %v141_v29 = vsel %vm140_vm2, %v131_v24, 0.0 }
  0xe5   :  { %v143_v30 = vsel %vm142_vm3, %v133_v28, 0.0  ;;  %v136_v33 = vsel %vm135_vm4, %v127_v27, 0.0 }
  0xe6   :  { %v144_v32 = vadd.f32 %v143_v30, %v141_v29  ;;  %v137_v34 = vadd.f32 %v136_v33, %v125_v31 }
  0xe8   :  { %145 = vadd.xlane.f32.xlu1 %v144_v32 }
  0xec   :  { %138 = vadd.xlane.f32.xlu1 %v137_v34 }
  0xfd   :  { %186 = vperm.xlu1 %1645, %v178_v35  }
 0x101   :  { %181 = vperm.xlu1 %1645, %v177_v36  }
 0x105   :  { %202 = vperm.xlu1 %1645, %v194_v37  }
 0x175   :  { %v146_v38 = vpop.xlane.xlu1 %145 }
 0x176   :  { %v149_v39 = vmul.f32 0.0069444445, %v146_v38 }
 0x178   :  { %v152_v40 = vsub.f32 %v131_v24, %v149_v39  ;;  %v153_v41 = vsub.f32 %v133_v28, %v149_v39 }
 0x179   :  { %v139_v42 = vpop.xlane.xlu1 %138 }
 0x17a   :  { %v148_v43 = vmul.f32 0.0069444445, %v139_v42  ;;  %v156_v44 = vmul.f32 %v152_v40, %v152_v40  ;;  %v157_v45 = vmul.f32 %v153_v41, %v153_v41 }
 0x17c   :  { %v150_v46 = vsub.f32 %v125_v31, %v148_v43  ;;  %v151_v47 = vsub.f32 %v127_v27, %v148_v43  ;;  %v162_v48 = vsel %vm140_vm2, %v156_v44, 0.0  ;;  %v163_v49 = vsel %vm142_vm3, %v157_v45, 0.0 }
 0x17d   :  { %v164_v50 = vadd.f32 %v163_v49, %v162_v48  ;;  %v187_v56 = vpop.permute.xlu1 %186 }
 0x17e   :  { %v154_v51 = vmul.f32 %v150_v46, %v150_v46  ;;  %v155_v52 = vmul.f32 %v151_v47, %v151_v47 }
 0x17f   :  { %165 = vadd.xlane.f32.xlu0 %v164_v50 }
 0x180   :  { %v158_v53 = vsel %vm135_vm4, %v155_v52, 0.0 }
 0x181   :  { %v159_v54 = vadd.f32 %v158_v53, %v154_v51  ;;  %v182_v57 = vpop.permute.xlu1 %181 }
 0x183   :  { %160 = vadd.xlane.f32.xlu1 %v159_v54 }
 0x185   :  { %v203_v58 = vpop.permute.xlu1 %202 }
 0x194   :  { %197 = vperm.xlu1 %1645, %v193_v55  }
 0x20c   :  { %v166_v59 = vpop.xlane.xlu0 %165 }
 0x20d   :  { %v168_v60 = vmul.f32 0.0069444445, %v166_v59 }
 0x20f   :  { %v170_v61 = vadd.f32 1e-05, %v168_v60 }
 0x210   :  { %v161_v62 = vpop.xlane.xlu1 %160 }
 0x211   :  { %1646 = vrsqrt.f32 %v170_v61  ;;  %v167_v63 = vmul.f32 0.0069444445, %v161_v62 }
 0x213   :  { %v169_v0 = vadd.f32 1e-05, %v167_v63 }
 0x214   :  { %v198_v15 = vpop.permute.xlu1 %197 }
 0x215   :  { %1648 = vrsqrt.f32 %v169_v0 }
 0x21b   :  { %v1647_v1 = vpop.eup %1646 }
 0x21c   :  { %v175_v2 = vmul.f32 %v1647_v1, %v152_v40  ;;  %v176_v3 = vmul.f32 %v1647_v1, %v153_v41 }
 0x21e   :  { %v191_v4 = vmul.f32 %v187_v56, %v175_v2  ;;  %v192_v5 = vmul.f32 %v187_v56, %v176_v3 }
 0x21f   :  { %v1649_v6 = vpop.eup %1648 }
 0x220   :  { %v207_v7 = vadd.f32 %v203_v58, %v191_v4  ;;  %v208_v8 = vadd.f32 %v203_v58, %v192_v5  ;;  %v173_v9 = vmul.f32 %v1649_v6, %v150_v46  ;;  %v174_v10 = vmul.f32 %v1649_v6, %v151_v47 }
 0x222   :  { %v211_v11 = vmul.f32 0.044715, %v207_v7  ;;  %v212_v12 = vmul.f32 0.044715, %v208_v8  ;;  %v189_v13 = vmul.f32 %v182_v57, %v173_v9  ;;  %v190_v14 = vmul.f32 %v182_v57, %v174_v10 }
 0x223   :  { %v231_v38 = vmul.f32 0.5, %v207_v7  ;;  %v232_v40 = vmul.f32 0.5, %v208_v8 }
 0x224   :  { %v215_v16 = vmul.f32 %v211_v11, %v207_v7  ;;  %v216_v17 = vmul.f32 %v212_v12, %v208_v8  ;;  %v205_v18 = vadd.f32 %v198_v15, %v189_v13  ;;  %v206_v19 = vadd.f32 %v198_v15, %v190_v14 }
 0x226   :  { %v219_v20 = vmul.f32 %v215_v16, %v207_v7  ;;  %v220_v21 = vmul.f32 %v216_v17, %v208_v8  ;;  %v209_v22 = vmul.f32 0.044715, %v205_v18  ;;  %v210_v23 = vmul.f32 0.044715, %v206_v19 }
 0x227   :  { %v229_v46 = vmul.f32 0.5, %v205_v18  ;;  %v230_v48 = vmul.f32 0.5, %v206_v19 }
 0x228   :  { %v223_v24 = vadd.f32 %v219_v20, %v207_v7  ;;  %v224_v25 = vadd.f32 %v220_v21, %v208_v8  ;;  %v213_v26 = vmul.f32 %v209_v22, %v205_v18  ;;  %v214_v27 = vmul.f32 %v210_v23, %v206_v19 }
 0x22a   :  { %v227_v28 = vmul.f32 0.7978846, %v223_v24  ;;  %v228_v29 = vmul.f32 0.7978846, %v224_v25  ;;  %v217_v30 = vmul.f32 %v213_v26, %v205_v18  ;;  %v218_v31 = vmul.f32 %v214_v27, %v206_v19 }
 0x22c   :  { %1650 = vtanh.f32 %v227_v28  ;;  %v221_v32 = vadd.f32 %v217_v30, %v205_v18  ;;  %v222_v33 = vadd.f32 %v218_v31, %v206_v19 }
 0x22d   :  { %1652 = vtanh.f32 %v228_v29 }
 0x22e   :  { %v225_v34 = vmul.f32 0.7978846, %v221_v32  ;;  %v226_v35 = vmul.f32 0.7978846, %v222_v33 }
 0x230   :  { %1654 = vtanh.f32 %v225_v34 }
 0x231   :  { %1656 = vtanh.f32 %v226_v35 }
 0x236   :  { %v1651_v36 = vpop.eup %1650 }
 0x237   :  { %v1653_v37 = vpop.eup %1652  ;;  %v239_v39 = vadd.f32 1.0, %v1651_v36 }
 0x238   :  { %v240_v41 = vadd.f32 1.0, %v1653_v37 }
 0x239   :  { %v243_v42 = vmul.f32 %v239_v39, %v231_v38 }
 0x23a   :  { %v1655_v43 = vpop.eup %1654  ;;  %v244_v44 = vmul.f32 %v240_v41, %v232_v40 }
 0x23b   :  { %v1657_v45 = vpop.eup %1656  ;;  %1658 = vrsqrt.f32 %v243_v42  ;;  %v237_v47 = vadd.f32 1.0, %v1655_v43  ;;  %v249_v51 = vsel %vm140_vm2, %v243_v42, -inf }
 0x23c   :  { %1660 = vrsqrt.f32 %v244_v44  ;;  %v238_v49 = vadd.f32 1.0, %v1657_v45  ;;  %v258_v54 = vsel %vm142_vm3, %v244_v44, -inf }
 0x23d   :  { %v241_v50 = vmul.f32 %v237_v47, %v229_v46 }
 0x23e   :  { %v242_v52 = vmul.f32 %v238_v49, %v230_v48 }
 0x23f   :  { %1662 = vrsqrt.f32 %v241_v50  ;;  %v250_v53 = vmax.f32 %v241_v50, %v249_v51 }
 0x240   :  { %1664 = vrsqrt.f32 %v242_v52  ;;  %v257_v55 = vsel %vm135_vm4, %v242_v52, -inf }
 0x241   :  { %v251_v56 = vrot.slane %v250_v53, 4  ;;  %v259_v57 = vmax.f32 %v257_v55, %v258_v54 }
 0x243   :  { %v252_v58 = vmax.f32 %v250_v53, %v251_v56  ;;  %v260_v59 = vrot.slane %v259_v57, 4 }
 0x245   :  { %v1781_v60 = vpop.eup %1658  ;;  %v253_v61 = vrot.slane %v252_v58, 2  ;;  %v261_v62 = vmax.f32 %v259_v57, %v260_v59 }
 0x246   :  { %v1783_v63 = vpop.eup %1660  ;;  %302 = vst.msk [vmem:[#allocation2 + $0x8] sm:$0x1] %vm142_vm3, %v1781_v60 }
 0x247   :  { %v254_v0 = vmax.f32 %v252_v58, %v253_v61  ;;  %v262_v1 = vrot.slane %v261_v62, 2  ;;  %437 = vst.msk [vmem:[#allocation2 + $0x88] sm:$0x1] %vm142_vm3, %v1783_v63 }
 0x249   :  { %v1789_v2 = vpop.eup %1662  ;;  %v255_v3 = vrot.slane %v254_v0, 1  ;;  %v263_v4 = vmax.f32 %v261_v62, %v262_v1 }
 0x24a   :  { %v1791_v5 = vpop.eup %1664  ;;  %301 = vst.msk [vmem:[#allocation2] sm:$0xff] %vm135_vm4, %v1789_v2  ;;  %345 = vrot.lane.b32.xlu0 %v1789_v2, %s1681_s4  ;;  %307 = vrot.lane.b32.xlu1 %v1789_v2, %s1682_s25 }
 0x24b   :  { %v256_v6 = vmax.f32 %v254_v0, %v255_v3  ;;  %v264_v7 = vrot.slane %v263_v4, 1  ;;  %436 = vst.msk [vmem:[#allocation2 + $0x80] sm:$0xff] %vm135_vm4, %v1791_v5 }
 0x24d   :  { %v265_v8 = vmax.f32 %v263_v4, %v264_v7  ;;  %v266_v9 = vsub.f32 %v241_v50, %v256_v6  ;;  %v268_v10 = vsub.f32 %v243_v42, %v256_v6 }
 0x24e   :  { %363 = vrot.lane.b32.xlu0 %v1789_v2, %s1683_s26  ;;  %327 = vrot.lane.b32.xlu1 %v1789_v2, %s1684_s27  ;;  %v521_v51 = vld [vmem:[#allocation2 + $0x88] sm:$0x1] }
 0x24f   :  { %v267_v11 = vsub.f32 %v242_v52, %v265_v8  ;;  %v269_v12 = vsub.f32 %v244_v44, %v265_v8  ;;  %v270_v13 = vmul.f32 1.442695, %v266_v9  ;;  %v274_v14 = vmul.f32 1.442695, %v268_v10 }
 0x251   :  { %1666 = vpow2.f32 %v270_v13  ;;  %v272_v15 = vmul.f32 1.442695, %v267_v11  ;;  %v276_v16 = vmul.f32 1.442695, %v269_v12  ;;  %v450_v10 = vld [vmem:[#allocation2 + $0x1] sm:$0x1] }
 0x252   :  { %1668 = vpow2.f32 %v274_v14  ;;  %381 = vrot.lane.b32.xlu0 %v1789_v2, %s1685_s28  ;;  %417 = vrot.lane.b32.xlu1 %v1789_v2, %s1686_s29  ;;  %v458_v17 = vld [vmem:[#allocation2 + $0x81] sm:$0x1]  ;;  %v467_v18 = vld [vmem:[#allocation2 + $0x82] sm:$0x1]  ;;  %v476_v23 = vld [vmem:[#allocation2 + $0x83] sm:$0x1] }
 0x253   :  { %1670 = vpow2.f32 %v272_v15  ;;  %v485_v30 = vld [vmem:[#allocation2 + $0x84] sm:$0x1]  ;;  %v494_v35 = vld [vmem:[#allocation2 + $0x85] sm:$0x1]  ;;  %v503_v40 = vld [vmem:[#allocation2 + $0x86] sm:$0x1] }
 0x254   :  { %1672 = vpow2.f32 %v276_v16  ;;  %v512_v44 = vld [vmem:[#allocation2 + $0x87] sm:$0x1]  ;;  %v459_v12 = vld [vmem:[#allocation2 + $0x2] sm:$0x1] }
 0x256   :  { %399 = vrot.lane.b32.xlu0 %v1789_v2, %s1687_s30  ;;  %579 = vrot.lane.b32.xlu1 %v458_v17, %s1686_s29 }
 0x25a   :  { %309 = vrot.lane.b32.xlu0 %v1781_v60, %s1682_s25  ;;  %608 = vrot.lane.b32.xlu1 %v467_v18, %s1687_s30 }
 0x25b   :  { %v1667_v19 = vpop.eup %1666 }
 0x25c   :  { %v1669_v20 = vpop.eup %1668 }
 0x25d   :  { %v1671_v21 = vpop.eup %1670  ;;  %v278_v22 = vsel %vm140_vm2, %v1669_v20, 0.0 }
 0x25e   :  { %v1673_v24 = vpop.eup %1672  ;;  %v279_v25 = vadd.f32 %v1667_v19, %v278_v22  ;;  %v286_v26 = vsel %vm135_vm4, %v1671_v21, 0.0  ;;  %329 = vrot.lane.b32.xlu0 %v1781_v60, %s1684_s27  ;;  %637 = vrot.lane.b32.xlu1 %v476_v23, %s1685_s28 }
 0x25f   :  { %v287_v27 = vsel %vm142_vm3, %v1673_v24, 0.0 }
 0x260   :  { %v280_v28 = vrot.slane %v279_v25, 4  ;;  %v288_v29 = vadd.f32 %v287_v27, %v286_v26 }
 0x262   :  { %v281_v31 = vadd.f32 %v280_v28, %v279_v25  ;;  %v289_v32 = vrot.slane %v288_v29, 4  ;;  %347 = vrot.lane.b32.xlu0 %v1781_v60, %s1681_s4  ;;  %666 = vrot.lane.b32.xlu1 %v485_v30, %s1683_s26  ;;  %v468_v28 = vld [vmem:[#allocation2 + $0x3] sm:$0x1] }
 0x264   :  { %v282_v33 = vrot.slane %v281_v31, 2  ;;  %v290_v34 = vadd.f32 %v289_v32, %v288_v29 }
 0x266   :  { %v283_v36 = vadd.f32 %v282_v33, %v281_v31  ;;  %v291_v37 = vrot.slane %v290_v34, 2  ;;  %365 = vrot.lane.b32.xlu0 %v1781_v60, %s1683_s26  ;;  %695 = vrot.lane.b32.xlu1 %v494_v35, %s1681_s4 }
 0x268   :  { %v284_v38 = vrot.slane %v283_v36, 1  ;;  %v292_v39 = vadd.f32 %v291_v37, %v290_v34 }
 0x26a   :  { %v285_v41 = vadd.f32 %v284_v38, %v283_v36  ;;  %v293_v42 = vrot.slane %v292_v39, 1  ;;  %383 = vrot.lane.b32.xlu0 %v1781_v60, %s1685_s28  ;;  %724 = vrot.lane.b32.xlu1 %v503_v40, %s1684_s27 }
 0x26c   :  { %v294_v43 = vadd.f32 %v293_v42, %v292_v39  ;;  %1674 = vrcp.f32 %v285_v41 }
 0x26e   :  { %1676 = vrcp.f32 %v294_v43  ;;  %401 = vrot.lane.b32.xlu0 %v1781_v60, %s1687_s30  ;;  %753 = vrot.lane.b32.xlu1 %v512_v44, %s1682_s25 }
 0x276   :  { %v1675_v45 = vpop.eup %1674 }
 0x277   :  { %v1833_v46 = vmul.f32 %v1675_v45, %v1667_v19  ;;  %v1835_v47 = vmul.f32 %v1675_v45, %v1669_v20  ;;  %v449_v19 = vld [vmem:[#allocation2 + $0x80] sm:$0x1] }
 0x278   :  { %v1677_v48 = vpop.eup %1676 }
 0x279   :  { %v1837_v49 = vmul.f32 %v1677_v48, %v1671_v21  ;;  %v1839_v50 = vmul.f32 %v1677_v48, %v1673_v24  ;;  %303 = vst.msk [vmem:[#allocation3] sm:$0xff] %vm135_vm4, %v1833_v46  ;;  %318 = vrot.lane.b32.xlu0 %v1833_v46, %s1682_s25  ;;  %336 = vrot.lane.b32.xlu1 %v1833_v46, %s1684_s27 }
 0x27a   :  { %304 = vst.msk [vmem:[#allocation3 + $0x8] sm:$0x1] %vm142_vm3, %v1835_v47 }
 0x27b   :  { %440 = vst.msk [vmem:[#allocation3 + $0x88] sm:$0x1] %vm142_vm3, %v1839_v50  ;;  %v1554_v54 = vadd.f32 %v1783_v63, %v1839_v50 }
 0x27c   :  { %439 = vst.msk [vmem:[#allocation3 + $0x80] sm:$0xff] %vm135_vm4, %v1837_v49 }
 0x27d   :  { %419 = vrot.lane.b32.xlu0 %v1781_v60, %s1686_s29  ;;  %354 = vrot.lane.b32.xlu1 %v1833_v46, %s1681_s4 }
 0x281   :  { %1495 = vrot.lane.b32.xlu0 %v1837_v49, %s1686_s29  ;;  %372 = vrot.lane.b32.xlu1 %v1833_v46, %s1683_s26 }
 0x282   :  { %v1865_v52 = vld [vmem:[#allocation3 + $0x88] ss:$0 sm:$0xff] }
 0x283   :  { %v1566_v53 = vmul.f32 %v1865_v52, %v521_v51  ;;  %v819_v0 = vld [vmem:[#allocation3 + $0x81] sm:$0x1]  ;;  %v828_v9 = vld [vmem:[#allocation3 + $0x82] sm:$0x1]  ;;  %v837_v30 = vld [vmem:[#allocation3 + $0x83] sm:$0x1] }
 0x285   :  { %1501 = vrot.lane.b32.xlu0 %v1837_v49, %s1687_s30  ;;  %390 = vrot.lane.b32.xlu1 %v1833_v46, %s1685_s28  ;;  %v1570_v55 = vmax.f32 %v1566_v53, 0.0 }
 0x287   :  { %v1574_v56 = vmul.f32 %v1570_v55, %v1554_v54  ;;  %v846_v55 = vld [vmem:[#allocation3 + $0x84] sm:$0x1] }
 0x289   :  { %1507 = vrot.lane.b32.xlu0 %v1837_v49, %s1685_s28  ;;  %408 = vrot.lane.b32.xlu1 %v1833_v46, %s1687_s30  ;;  %1620 = vst.msk [vmem:[%s2845_s5 + $0x118] sm:$0x1] %vm142_vm3, %v1574_v56 }
 0x28d   :  { %1513 = vrot.lane.b32.xlu0 %v1837_v49, %s1683_s26  ;;  %426 = vrot.lane.b32.xlu1 %v1833_v46, %s1686_s29 }
 0x291   :  { %1519 = vrot.lane.b32.xlu0 %v1837_v49, %s1681_s4  ;;  %320 = vrot.lane.b32.xlu1 %v1835_v47, %s1682_s25 }
 0x295   :  { %1525 = vrot.lane.b32.xlu0 %v1837_v49, %s1684_s27  ;;  %338 = vrot.lane.b32.xlu1 %v1835_v47, %s1684_s27 }
 0x299   :  { %356 = vrot.lane.b32.xlu1 %v1835_v47, %s1681_s4 }
 0x29d   :  { %374 = vrot.lane.b32.xlu1 %v1835_v47, %s1683_s26 }
 0x2a1   :  { %392 = vrot.lane.b32.xlu1 %v1835_v47, %s1685_s28 }
 0x2a5   :  { %410 = vrot.lane.b32.xlu1 %v1835_v47, %s1687_s30 }
 0x2a9   :  { %428 = vrot.lane.b32.xlu1 %v1835_v47, %s1686_s29 }
 0x2ad   :  { %1497 = vrot.lane.b32.xlu1 %v1839_v50, %s1686_s29 }
 0x2b1   :  { %1503 = vrot.lane.b32.xlu1 %v1839_v50, %s1687_s30 }
 0x2b5   :  { %1509 = vrot.lane.b32.xlu1 %v1839_v50, %s1685_s28 }
 0x2b9   :  { %1515 = vrot.lane.b32.xlu1 %v1839_v50, %s1683_s26 }
 0x2bc   :  { %v346_v57 = vpop.permute.xlu0 %345  ;;  %v308_v58 = vpop.permute.xlu1 %307 }
 0x2bd   :  { %352 = vst.msk [vmem:[#allocation2 + $0x30] sm:$0xff] %vm135_vm4, %v346_v57  ;;  %1521 = vrot.lane.b32.xlu1 %v1839_v50, %s1681_s4  ;;  %314 = vst.msk [vmem:[#allocation2 + $0x10] sm:$0xff] %vm135_vm4, %v308_v58 }
 0x2c0   :  { %v364_v59 = vpop.permute.xlu0 %363  ;;  %v328_v61 = vpop.permute.xlu1 %327 }
 0x2c1   :  { %370 = vst.msk [vmem:[#allocation2 + $0x40] sm:$0xff] %vm135_vm4, %v364_v59  ;;  %1527 = vrot.lane.b32.xlu1 %v1839_v50, %s1684_s27  ;;  %334 = vst.msk [vmem:[#allocation2 + $0x20] sm:$0xff] %vm135_vm4, %v328_v61 }
 0x2c4   :  { %v382_v62 = vpop.permute.xlu0 %381  ;;  %v418_v1 = vpop.permute.xlu1 %417  ;;  %v451_v3 = vld [vmem:[#allocation2 + $0x11] sm:$0x1]  ;;  %v460_v4 = vld [vmem:[#allocation2 + $0x12] sm:$0x1]  ;;  %v469_v8 = vld [vmem:[#allocation2 + $0x13] sm:$0x1] }
 0x2c5   :  { %388 = vst.msk [vmem:[#allocation2 + $0x50] sm:$0xff] %vm135_vm4, %v382_v62  ;;  %933 = vrot.lane.b32.xlu1 %v819_v0, %s1686_s29  ;;  %424 = vst.msk [vmem:[#allocation2 + $0x70] sm:$0xff] %vm135_vm4, %v418_v1  ;;  %v563_v6 = vrot.slane %v451_v3, 7  ;;  %v592_v7 = vrot.slane %v460_v4, 7  ;;  %v453_v11 = vld [vmem:[#allocation2 + $0x31] sm:$0x1] }
 0x2c6   :  { %v462_v13 = vld [vmem:[#allocation2 + $0x32] sm:$0x1]  ;;  %v471_v18 = vld [vmem:[#allocation2 + $0x33] sm:$0x1]  ;;  %v621_v23 = vrot.slane %v469_v8, 7  ;;  %v567_v25 = vrot.slane %v453_v11, 5 }
 0x2c7   :  { %v564_v24 = vsel %vm532_vm5, %v563_v6, %v450_v10  ;;  %v593_v27 = vsel %vm532_vm5, %v592_v7, %v459_v12  ;;  %v596_v33 = vrot.slane %v462_v13, 5  ;;  %v478_v35 = vld [vmem:[#allocation2 + $0x14] sm:$0x1]  ;;  %v625_v43 = vrot.slane %v471_v18, 5  ;;  %v477_v4 = vld [vmem:[#allocation2 + $0x4] sm:$0x1] }
 0x2c8   :  { %v400_v14 = vpop.permute.xlu0 %399  ;;  %v580_v15 = vpop.permute.xlu1 %579  ;;  %v452_v16 = vld [vmem:[#allocation2 + $0x21] sm:$0x1]  ;;  %v461_v17 = vld [vmem:[#allocation2 + $0x22] sm:$0x1]  ;;  %v470_v29 = vld [vmem:[#allocation2 + $0x23] sm:$0x1]  ;;  %v622_v54 = vsel %vm532_vm5, %v621_v23, %v468_v28 }
 0x2c9   :  { %406 = vst.msk [vmem:[#allocation2 + $0x60] sm:$0xff] %vm135_vm4, %v400_v14  ;;  %962 = vrot.lane.b32.xlu1 %v828_v9, %s1687_s30  ;;  %v454_v20 = vld [vmem:[#allocation2 + $0x41] sm:$0x1]  ;;  %v565_v21 = vrot.slane %v452_v16, 6  ;;  %v594_v22 = vrot.slane %v461_v17, 6  ;;  %v623_v34 = vrot.slane %v470_v29, 6  ;;  %v783_v36 = vsel %vm135_vm4, %v449_v19, %v580_v15 }
 0x2ca   :  { %v463_v26 = vld [vmem:[#allocation2 + $0x42] sm:$0x1]  ;;  %v569_v41 = vrot.slane %v454_v20, 4  ;;  %v472_v53 = vld [vmem:[#allocation2 + $0x43] sm:$0x1]  ;;  %v650_v62 = vrot.slane %v478_v35, 7 }
 0x2cb   :  { %v566_v31 = vsel %vm535_vm7, %v565_v21, %v564_v24  ;;  %v595_v32 = vsel %vm535_vm7, %v594_v22, %v593_v27  ;;  %v598_v51 = vrot.slane %v463_v26, 4  ;;  %v624_v58 = vsel %vm535_vm7, %v623_v34, %v622_v54  ;;  %v479_v59 = vld [vmem:[#allocation2 + $0x24] sm:$0x1]  ;;  %v480_v61 = vld [vmem:[#allocation2 + $0x34] sm:$0x1] }
 0x2cc   :  { %v310_v37 = vpop.permute.xlu0 %309  ;;  %v609_v38 = vpop.permute.xlu1 %608  ;;  %v455_v39 = vld [vmem:[#allocation2 + $0x51] sm:$0x1]  ;;  %v568_v40 = vsel %vm538_vm8, %v567_v25, %v566_v31  ;;  %v464_v42 = vld [vmem:[#allocation2 + $0x52] sm:$0x1]  ;;  %v597_v48 = vsel %vm538_vm8, %v596_v33, %v595_v32  ;;  %v473_v3 = vld [vmem:[#allocation2 + $0x53] sm:$0x1]  ;;  %v626_v13 = vsel %vm538_vm8, %v625_v43, %v624_v58  ;;  %v651_v23 = vsel %vm532_vm5, %v650_v62, %v477_v4 }
 0x2cd   :  { %315 = vst.msk [vmem:[#allocation2 + $0x18] sm:$0x1] %vm142_vm3, %v310_v37  ;;  %991 = vrot.lane.b32.xlu1 %v837_v30, %s1685_s28  ;;  %v786_v44 = vsel %vm784_vm6, %v783_v36, %v609_v38  ;;  %v457_v45 = vld [vmem:[#allocation2 + $0x71] sm:$0x1]  ;;  %v571_v56 = vrot.slane %v455_v39, 3  ;;  %v570_v0 = vsel %vm541_vm10, %v569_v41, %v568_v40  ;;  %v600_v1 = vrot.slane %v464_v42, 3 }
 0x2ce   :  { %v1932_v57 = vld [vmem:[#allocation2 + $0x72] sm:$0x1]  ;;  %v481_v6 = vld [vmem:[#allocation2 + $0x44] sm:$0x1]  ;;  %v575_v10 = vrot.slane %v457_v45, 1  ;;  %v599_v12 = vsel %vm541_vm10, %v598_v51, %v597_v48  ;;  %v627_v14 = vrot.slane %v472_v53, 4 }
 0x2cf   :  { %v604_v18 = vrot.slane %v1932_v57, 1  ;;  %v572_v20 = vsel %vm544_vm11, %v571_v56, %v570_v0  ;;  %v629_v21 = vrot.slane %v473_v3, 3  ;;  %v482_v22 = vld [vmem:[#allocation2 + $0x54] sm:$0x1]  ;;  %v652_v24 = vrot.slane %v479_v59, 6 }
 0x2d0   :  { %v330_v7 = vpop.permute.xlu0 %329  ;;  %v638_v8 = vpop.permute.xlu1 %637  ;;  %v456_v9 = vld [vmem:[#allocation2 + $0x61] sm:$0x1]  ;;  %v465_v11 = vld [vmem:[#allocation2 + $0x62] sm:$0x1]  ;;  %v474_v19 = vld [vmem:[#allocation2 + $0x63] sm:$0x1]  ;;  %v601_v27 = vsel %vm544_vm11, %v600_v1, %v599_v12  ;;  %v628_v28 = vsel %vm541_vm10, %v627_v14, %v626_v13 }
 0x2d1   :  { %335 = vst.msk [vmem:[#allocation2 + $0x28] sm:$0x1] %vm142_vm3, %v330_v7  ;;  %1020 = vrot.lane.b32.xlu1 %v846_v55, %s1683_s26  ;;  %v789_v15 = vsel %vm787_vm9, %v786_v44, %v638_v8  ;;  %v573_v16 = vrot.slane %v456_v9, 2  ;;  %v602_v17 = vrot.slane %v465_v11, 2  ;;  %v487_v25 = vld [vmem:[#allocation2 + $0x15] sm:$0x1]  ;;  %v653_v37 = vsel %vm535_vm7, %v652_v24, %v651_v23 }
 0x2d2   :  { %v483_v29 = vld [vmem:[#allocation2 + $0x64] sm:$0x1]  ;;  %v654_v30 = vrot.slane %v480_v61, 5  ;;  %v488_v31 = vld [vmem:[#allocation2 + $0x25] sm:$0x1]  ;;  %v631_v36 = vrot.slane %v474_v19, 2  ;;  %v630_v55 = vsel %vm544_vm11, %v629_v21, %v628_v28 }
 0x2d3   :  { %v574_v26 = vsel %vm547_vm12, %v573_v16, %v572_v20  ;;  %v855_v33 = vld [vmem:[#allocation3 + $0x85] sm:$0x1]  ;;  %v656_v38 = vrot.slane %v481_v6, 4  ;;  %v603_v40 = vsel %vm547_vm12, %v602_v17, %v601_v27  ;;  %v658_v42 = vrot.slane %v482_v22, 3  ;;  %v486_v43 = vld [vmem:[#allocation2 + $0x5] sm:$0x1] }
 0x2d4   :  { %v348_v32 = vpop.permute.xlu0 %347  ;;  %v667_v34 = vpop.permute.xlu1 %666  ;;  %v576_v35 = vsel %vm550_vm13, %v575_v10, %v574_v26  ;;  %v655_v41 = vsel %vm538_vm8, %v654_v30, %v653_v37  ;;  %v489_v44 = vld [vmem:[#allocation2 + $0x35] sm:$0x1]  ;;  %v475_v45 = vld [vmem:[#allocation2 + $0x73] sm:$0x1]  ;;  %v660_v51 = vrot.slane %v483_v29, 2  ;;  %v679_v53 = vrot.slane %v487_v25, 7 }
 0x2d5   :  { %353 = vst.msk [vmem:[#allocation2 + $0x38] sm:$0x1] %vm142_vm3, %v348_v32  ;;  %1049 = vrot.lane.b32.xlu1 %v855_v33, %s1681_s4  ;;  %v792_v39 = vsel %vm790_vm14, %v789_v15, %v667_v34  ;;  %577 = vrot.lane.b32.xlu0 %v576_v35, %s1686_s29  ;;  %v657_v48 = vsel %vm541_vm10, %v656_v38, %v655_v41  ;;  %v681_v54 = vrot.slane %v488_v31, 6  ;;  %v490_v56 = vld [vmem:[#allocation2 + $0x45] sm:$0x1]  ;;  %v683_v6 = vrot.slane %v489_v44, 5 }
 0x2d6   :  { %v496_v57 = vld [vmem:[#allocation2 + $0x16] sm:$0x1]  ;;  %v497_v58 = vld [vmem:[#allocation2 + $0x26] sm:$0x1]  ;;  %v605_v0 = vsel %vm550_vm13, %v604_v18, %v603_v40  ;;  %v632_v1 = vsel %vm547_vm12, %v631_v36, %v630_v55  ;;  %v491_v3 = vld [vmem:[#allocation2 + $0x55] sm:$0x1]  ;;  %v680_v4 = vsel %vm532_vm5, %v679_v53, %v486_v43  ;;  %v659_v9 = vsel %vm544_vm11, %v658_v42, %v657_v48 }
 0x2d7   :  { %v864_v61 = vld [vmem:[#allocation3 + $0x86] sm:$0x1]  ;;  %v633_v8 = vrot.slane %v475_v45, 1  ;;  %v492_v10 = vld [vmem:[#allocation2 + $0x65] sm:$0x1]  ;;  %v682_v11 = vsel %vm535_vm7, %v681_v54, %v680_v4  ;;  %v685_v16 = vrot.slane %v490_v56, 4  ;;  %v661_v21 = vsel %vm547_vm12, %v660_v51, %v659_v9 }
 0x2d8   :  { %v366_v59 = vpop.permute.xlu0 %365  ;;  %v696_v62 = vpop.permute.xlu1 %695  ;;  %v495_v12 = vld [vmem:[#allocation2 + $0x6] sm:$0x1]  ;;  %v498_v13 = vld [vmem:[#allocation2 + $0x36] sm:$0x1]  ;;  %v484_v14 = vld [vmem:[#allocation2 + $0x74] sm:$0x1]  ;;  %v684_v15 = vsel %vm538_vm8, %v683_v6, %v682_v11 }
 0x2d9   :  { %371 = vst.msk [vmem:[#allocation2 + $0x48] sm:$0x1] %vm142_vm3, %v366_v59  ;;  %1078 = vrot.lane.b32.xlu1 %v864_v61, %s1684_s27  ;;  %v795_v7 = vsel %vm793_vm15, %v792_v39, %v696_v62  ;;  %606 = vrot.lane.b32.xlu0 %v605_v0, %s1687_s30  ;;  %v708_v17 = vrot.slane %v496_v57, 7  ;;  %v710_v18 = vrot.slane %v497_v58, 6  ;;  %v873_v19 = vld [vmem:[#allocation3 + $0x87] sm:$0x1]  ;;  %v634_v20 = vsel %vm550_vm13, %v633_v8, %v632_v1 }
 0x2da   :  { %v687_v22 = vrot.slane %v491_v3, 3  ;;  %v505_v23 = vld [vmem:[#allocation2 + $0x17] sm:$0x1]  ;;  %v686_v26 = vsel %vm541_vm10, %v685_v16, %v684_v15  ;;  %v689_v27 = vrot.slane %v492_v10, 2  ;;  %v499_v28 = vld [vmem:[#allocation2 + $0x46] sm:$0x1] }
 0x2db   :  { %v709_v29 = vsel %vm532_vm5, %v708_v17, %v495_v12  ;;  %v712_v30 = vrot.slane %v498_v13, 5  ;;  %v506_v31 = vld [vmem:[#allocation2 + $0x27] sm:$0x1]  ;;  %v662_v33 = vrot.slane %v484_v14, 1  ;;  %v500_v34 = vld [vmem:[#allocation2 + $0x56] sm:$0x1] }
 0x2dc   :  { %v384_v24 = vpop.permute.xlu0 %383  ;;  %v725_v25 = vpop.permute.xlu1 %724  ;;  %v711_v35 = vsel %vm535_vm7, %v710_v18, %v709_v29  ;;  %v507_v36 = vld [vmem:[#allocation2 + $0x37] sm:$0x1]  ;;  %v501_v37 = vld [vmem:[#allocation2 + $0x66] sm:$0x1]  ;;  %v737_v39 = vrot.slane %v505_v23, 7  ;;  %v688_v42 = vsel %vm544_vm11, %v687_v22, %v686_v26  ;;  %v714_v43 = vrot.slane %v499_v28, 4 }
 0x2dd   :  { %389 = vst.msk [vmem:[#allocation2 + $0x58] sm:$0x1] %vm142_vm3, %v384_v24  ;;  %1107 = vrot.lane.b32.xlu1 %v873_v19, %s1682_s25  ;;  %v798_v32 = vsel %vm796_vm0, %v795_v7, %v725_v25  ;;  %635 = vrot.lane.b32.xlu0 %v634_v20, %s1685_s28  ;;  %v713_v38 = vsel %vm538_vm8, %v712_v30, %v711_v35  ;;  %v493_v41 = vld [vmem:[#allocation2 + $0x75] sm:$0x1]  ;;  %v504_v44 = vld [vmem:[#allocation2 + $0x7] sm:$0x1] }
 0x2de   :  { %v663_v40 = vsel %vm550_vm13, %v662_v33, %v661_v21  ;;  %v739_v45 = vrot.slane %v506_v31, 6  ;;  %v690_v53 = vsel %vm547_vm12, %v689_v27, %v688_v42  ;;  %v716_v54 = vrot.slane %v500_v34, 3  ;;  %v508_v55 = vld [vmem:[#allocation2 + $0x47] sm:$0x1]  ;;  %v509_v62 = vld [vmem:[#allocation2 + $0x57] sm:$0x1] }
 0x2df   :  { %v738_v56 = vsel %vm532_vm5, %v737_v39, %v504_v44  ;;  %v741_v57 = vrot.slane %v507_v36, 5  ;;  %v715_v59 = vsel %vm541_vm10, %v714_v43, %v713_v38  ;;  %v718_v61 = vrot.slane %v501_v37, 2  ;;  %v510_v3 = vld [vmem:[#allocation2 + $0x67] sm:$0x1]  ;;  %v502_v6 = vld [vmem:[#allocation2 + $0x76] sm:$0x1] }
 0x2e0   :  { %v402_v48 = vpop.permute.xlu0 %401  ;;  %v754_v51 = vpop.permute.xlu1 %753  ;;  %v740_v0 = vsel %vm535_vm7, %v739_v45, %v738_v56  ;;  %v691_v1 = vrot.slane %v493_v41, 1  ;;  %v743_v7 = vrot.slane %v508_v55, 4  ;;  %v717_v9 = vsel %vm544_vm11, %v716_v54, %v715_v59  ;;  %v511_v15 = vld [vmem:[#allocation2 + $0x77] sm:$0x1]  ;;  %v514_v27 = vld [vmem:[#allocation2 + $0x18] sm:$0x1] }
 0x2e1   :  { %407 = vst.msk [vmem:[#allocation2 + $0x68] sm:$0x1] %vm142_vm3, %v402_v48  ;;  %1533 = vrot.lane.b32.xlu1 %v1839_v50, %s1682_s25  ;;  %v1985_v58 = vsel %vm799_vm1, %v798_v32, %v754_v51  ;;  %664 = vrot.lane.b32.xlu0 %v663_v40, %s1683_s26  ;;  %v742_v4 = vsel %vm538_vm8, %v741_v57, %v740_v0  ;;  %v745_v10 = vrot.slane %v509_v62, 3  ;;  %v747_v13 = vrot.slane %v510_v3, 2  ;;  %v515_v28 = vld [vmem:[#allocation2 + $0x28] sm:$0x1] }
 0x2e2   :  { %v692_v8 = vsel %vm550_vm13, %v691_v1, %v690_v53  ;;  %v719_v11 = vsel %vm547_vm12, %v718_v61, %v717_v9  ;;  %v744_v12 = vsel %vm541_vm10, %v743_v7, %v742_v4  ;;  %v720_v14 = vrot.slane %v502_v6, 1  ;;  %v516_v29 = vld [vmem:[#allocation2 + $0x38] sm:$0x1]  ;;  %v513_v34 = vld [vmem:[#allocation2 + $0x8] sm:$0x1] }
 0x2e3   :  { %v746_v17 = vsel %vm544_vm11, %v745_v10, %v744_v12  ;;  %v749_v19 = vrot.slane %v511_v15, 1  ;;  %v766_v30 = vrot.slane %v514_v27, 7  ;;  %v768_v35 = vrot.slane %v515_v28, 6  ;;  %v517_v37 = vld [vmem:[#allocation2 + $0x48] sm:$0x1] }
 0x2e4   :  { %v721_v16 = vsel %vm550_vm13, %v720_v14, %v719_v11  ;;  %v748_v18 = vsel %vm547_vm12, %v747_v13, %v746_v17  ;;  %v770_v36 = vrot.slane %v516_v29, 5  ;;  %v518_v39 = vld [vmem:[#allocation2 + $0x58] sm:$0x1]  ;;  %v772_v48 = vrot.slane %v517_v37, 4  ;;  %v811_v61 = vld [vmem:[#allocation3 + $0x1] sm:$0x1] }
 0x2e5   :  { %693 = vrot.lane.b32.xlu0 %v692_v8, %s1681_s4  ;;  %v750_v22 = vsel %vm550_vm13, %v749_v19, %v748_v18  ;;  %v767_v45 = vsel %vm532_vm5, %v766_v30, %v513_v34  ;;  %v774_v55 = vrot.slane %v518_v39, 3  ;;  %v820_v7 = vld [vmem:[#allocation3 + $0x2] sm:$0x1]  ;;  %v829_v8 = vld [vmem:[#allocation3 + $0x3] sm:$0x1]  ;;  %v1168_v17 = vlaneseq }
 0x2e6   :  { %v769_v54 = vsel %vm535_vm7, %v768_v35, %v767_v45  ;;  %v2039_v18 = vadd.f32 %v1791_v5, %v1837_v49 }
 0x2e7   :  { %v771_v4 = vsel %vm538_vm8, %v770_v36, %v769_v54 }
 0x2e8   :  { %v519_v40 = vld [vmem:[#allocation2 + $0x68] sm:$0x1]  ;;  %v773_v11 = vsel %vm541_vm10, %v772_v48, %v771_v4 }
 0x2e9   :  { %722 = vrot.lane.b32.xlu0 %v721_v16, %s1684_s27  ;;  %v776_v59 = vrot.slane %v519_v40, 2  ;;  %v775_v19 = vsel %vm544_vm11, %v774_v55, %v773_v11 }
 0x2eb   :  { %v2000_v20 = vpop.permute.xlu0 %318  ;;  %v2002_v21 = vpop.permute.xlu1 %336  ;;  %v777_v54 = vsel %vm547_vm12, %v776_v59, %v775_v19 }
 0x2ec   :  { %325 = vst.msk [vmem:[#allocation3 + $0x10] sm:$0xff] %vm135_vm4, %v2000_v20  ;;  %343 = vst.msk [vmem:[#allocation3 + $0x20] sm:$0xff] %vm135_vm4, %v2002_v21 }
 0x2ed   :  { %751 = vrot.lane.b32.xlu0 %v750_v22, %s1682_s25 }
 0x2ef   :  { %v420_v23 = vpop.permute.xlu0 %419  ;;  %v2010_v24 = vpop.permute.xlu1 %354 }
 0x2f0   :  { %425 = vst.msk [vmem:[#allocation2 + $0x78] sm:$0x1] %vm142_vm3, %v420_v23 }
 0x2f1   :  { %361 = vst.msk [vmem:[#allocation3 + $0x30] sm:$0xff] %vm135_vm4, %v2010_v24 }
 0x2f3   :  { %v1496_v25 = vpop.permute.xlu0 %1495  ;;  %v2015_v26 = vpop.permute.xlu1 %372  ;;  %v812_v41 = vld [vmem:[#allocation3 + $0x11] sm:$0x1]  ;;  %v813_v42 = vld [vmem:[#allocation3 + $0x21] sm:$0x1]  ;;  %v821_v43 = vld [vmem:[#allocation3 + $0x12] sm:$0x1] }
 0x2f4   :  { %379 = vst.msk [vmem:[#allocation3 + $0x40] sm:$0xff] %vm135_vm4, %v2015_v26  ;;  %v1537_v31 = vsel %vm135_vm4, %v1837_v49, %v1496_v25  ;;  %v830_v44 = vld [vmem:[#allocation3 + $0x13] sm:$0x1]  ;;  %v917_v57 = vrot.slane %v812_v41, 7  ;;  %v919_v62 = vrot.slane %v813_v42, 6  ;;  %v946_v1 = vrot.slane %v821_v43, 7 }
 0x2f5   :  { %v822_v0 = vld [vmem:[#allocation3 + $0x22] sm:$0x1]  ;;  %v975_v3 = vrot.slane %v830_v44, 7  ;;  %v831_v9 = vld [vmem:[#allocation3 + $0x23] sm:$0x1] }
 0x2f6   :  { %v839_v10 = vld [vmem:[#allocation3 + $0x14] sm:$0x1]  ;;  %v918_v25 = vsel %vm532_vm5, %v917_v57, %v811_v61  ;;  %v948_v28 = vrot.slane %v822_v0, 6  ;;  %v947_v30 = vsel %vm532_vm5, %v946_v1, %v820_v7  ;;  %v840_v34 = vld [vmem:[#allocation3 + $0x24] sm:$0x1] }
 0x2f7   :  { %v1502_v32 = vpop.permute.xlu0 %1501  ;;  %v2021_v33 = vpop.permute.xlu1 %390  ;;  %v520_v6 = vld [vmem:[#allocation2 + $0x78] sm:$0x1]  ;;  %v1004_v35 = vrot.slane %v839_v10, 7  ;;  %v920_v44 = vsel %vm535_vm7, %v919_v62, %v918_v25  ;;  %v1006_v1 = vrot.slane %v840_v34, 6 }
 0x2f8   :  { %v1539_v38 = vsel %vm784_vm6, %v1537_v31, %v1502_v32  ;;  %397 = vst.msk [vmem:[#allocation3 + $0x50] sm:$0xff] %vm135_vm4, %v2021_v33  ;;  %v814_v14 = vld [vmem:[#allocation3 + $0x31] sm:$0x1]  ;;  %v823_v15 = vld [vmem:[#allocation3 + $0x32] sm:$0x1]  ;;  %v976_v31 = vsel %vm532_vm5, %v975_v3, %v829_v8  ;;  %v977_v32 = vrot.slane %v831_v9, 6  ;;  %v949_v61 = vsel %vm535_vm7, %v948_v28, %v947_v30 }
 0x2f9   :  { %v832_v16 = vld [vmem:[#allocation3 + $0x33] sm:$0x1]  ;;  %v778_v36 = vrot.slane %v520_v6, 1  ;;  %v921_v37 = vrot.slane %v814_v14, 5  ;;  %v841_v0 = vld [vmem:[#allocation3 + $0x34] sm:$0x1] }
 0x2fa   :  { %v979_v40 = vrot.slane %v832_v16, 5  ;;  %v978_v4 = vsel %vm535_vm7, %v977_v32, %v976_v31 }
 0x2fb   :  { %v1508_v51 = vpop.permute.xlu0 %1507  ;;  %v2027_v53 = vpop.permute.xlu1 %408  ;;  %v815_v23 = vld [vmem:[#allocation3 + $0x41] sm:$0x1]  ;;  %v824_v27 = vld [vmem:[#allocation3 + $0x42] sm:$0x1]  ;;  %v833_v39 = vld [vmem:[#allocation3 + $0x43] sm:$0x1]  ;;  %v922_v7 = vsel %vm538_vm8, %v921_v37, %v920_v44 }
 0x2fc   :  { %v1541_v56 = vsel %vm787_vm9, %v1539_v38, %v1508_v51  ;;  %415 = vst.msk [vmem:[#allocation3 + $0x60] sm:$0xff] %vm135_vm4, %v2027_v53  ;;  %v950_v38 = vrot.slane %v823_v15, 5  ;;  %v923_v45 = vrot.slane %v815_v23, 4  ;;  %v952_v48 = vrot.slane %v824_v27, 4  ;;  %v838_v51 = vld [vmem:[#allocation3 + $0x4] sm:$0x1] }
 0x2fd   :  { %v981_v62 = vrot.slane %v833_v39, 4  ;;  %v1005_v6 = vsel %vm532_vm5, %v1004_v35, %v838_v51  ;;  %v980_v10 = vsel %vm538_vm8, %v979_v40, %v978_v4  ;;  %v842_v11 = vld [vmem:[#allocation3 + $0x44] sm:$0x1]  ;;  %v1008_v27 = vrot.slane %v841_v0, 5  ;;  %v848_v40 = vld [vmem:[#allocation3 + $0x15] sm:$0x1] }
 0x2fe   :  { %v951_v8 = vsel %vm538_vm8, %v950_v38, %v949_v61  ;;  %v924_v19 = vsel %vm541_vm10, %v923_v45, %v922_v7  ;;  %v1007_v34 = vsel %vm535_vm7, %v1006_v1, %v1005_v6  ;;  %v1010_v45 = vrot.slane %v842_v11, 4  ;;  %v857_v0 = vld [vmem:[#allocation3 + $0x16] sm:$0x1]  ;;  %v849_v4 = vld [vmem:[#allocation3 + $0x25] sm:$0x1] }
 0x2ff   :  { %v1514_v12 = vpop.permute.xlu0 %1513  ;;  %v2035_v13 = vpop.permute.xlu1 %426  ;;  %v816_v29 = vld [vmem:[#allocation3 + $0x51] sm:$0x1]  ;;  %v825_v57 = vld [vmem:[#allocation3 + $0x52] sm:$0x1]  ;;  %v834_v9 = vld [vmem:[#allocation3 + $0x53] sm:$0x1]  ;;  %v953_v23 = vsel %vm541_vm10, %v952_v48, %v951_v8  ;;  %v982_v38 = vsel %vm541_vm10, %v981_v62, %v980_v10 }
 0x300   :  { %v1543_v22 = vsel %vm790_vm14, %v1541_v56, %v1514_v12  ;;  %433 = vst.msk [vmem:[#allocation3 + $0x70] sm:$0xff] %vm135_vm4, %v2035_v13  ;;  %v925_v56 = vrot.slane %v816_v29, 3  ;;  %v2062_v12 = vsel %vm550_vm13, %v778_v36, %v777_v54  ;;  %v954_v25 = vrot.slane %v825_v57, 3  ;;  %v843_v32 = vld [vmem:[#allocation3 + $0x54] sm:$0x1] }
 0x301   :  { %v983_v39 = vrot.slane %v834_v9, 3  ;;  %v2080_v48 = vmul.f32 %v1865_v52, %v2062_v12  ;;  %v1009_v57 = vsel %vm538_vm8, %v1008_v27, %v1007_v34  ;;  %v1012_v61 = vrot.slane %v843_v32, 3  ;;  %v847_v9 = vld [vmem:[#allocation3 + $0x5] sm:$0x1]  ;;  %v850_v10 = vld [vmem:[#allocation3 + $0x35] sm:$0x1] }
 0x302   :  { %v926_v29 = vsel %vm544_vm11, %v925_v56, %v924_v19  ;;  %v955_v54 = vsel %vm544_vm11, %v954_v25, %v953_v23  ;;  %v1033_v62 = vrot.slane %v848_v40, 7  ;;  %v851_v19 = vld [vmem:[#allocation3 + $0x45] sm:$0x1]  ;;  %v1062_v23 = vrot.slane %v857_v0, 7  ;;  %v856_v34 = vld [vmem:[#allocation3 + $0x6] sm:$0x1] }
 0x303   :  { %v1520_v41 = vpop.permute.xlu0 %1519  ;;  %v2048_v42 = vpop.permute.xlu1 %320  ;;  %v817_v43 = vld [vmem:[#allocation3 + $0x61] sm:$0x1]  ;;  %v826_v59 = vld [vmem:[#allocation3 + $0x62] sm:$0x1]  ;;  %v835_v31 = vld [vmem:[#allocation3 + $0x63] sm:$0x1] }
 0x304   :  { %v1545_v55 = vsel %vm793_vm15, %v1543_v22, %v1520_v41  ;;  %326 = vst.msk [vmem:[#allocation3 + $0x18] sm:$0x1] %vm142_vm3, %v2048_v42  ;;  %v927_v3 = vrot.slane %v817_v43, 2  ;;  %v956_v36 = vrot.slane %v826_v59, 2  ;;  %v844_v44 = vld [vmem:[#allocation3 + $0x64] sm:$0x1]  ;;  %v2098_v6 = vsel %vm135_vm4, %v2048_v42, %v1835_v47 }
 0x305   :  { %v984_v59 = vsel %vm544_vm11, %v983_v39, %v982_v38  ;;  %v1014_v8 = vrot.slane %v844_v44, 2  ;;  %v1035_v32 = vrot.slane %v849_v4, 6  ;;  %v853_v38 = vld [vmem:[#allocation3 + $0x65] sm:$0x1]  ;;  %v1034_v39 = vsel %vm532_vm5, %v1033_v62, %v847_v9  ;;  %v861_v0 = vld [vmem:[#allocation3 + $0x56] sm:$0x1] }
 0x306   :  { %v928_v35 = vsel %vm547_vm12, %v927_v3, %v926_v29  ;;  %v957_v7 = vsel %vm547_vm12, %v956_v36, %v955_v54  ;;  %v1037_v40 = vrot.slane %v850_v10, 5  ;;  %v1039_v54 = vrot.slane %v851_v19, 4  ;;  %v867_v9 = vld [vmem:[#allocation3 + $0x27] sm:$0x1] }
 0x307   :  { %v1526_v14 = vpop.permute.xlu0 %1525  ;;  %v2064_v15 = vpop.permute.xlu1 %338  ;;  %v818_v16 = vld [vmem:[#allocation3 + $0x71] sm:$0x1]  ;;  %v827_v22 = vld [vmem:[#allocation3 + $0x72] sm:$0x1]  ;;  %v836_v37 = vld [vmem:[#allocation3 + $0x73] sm:$0x1] }
 0x308   :  { %v2069_v28 = vsel %vm796_vm0, %v1545_v55, %v1526_v14  ;;  %344 = vst.msk [vmem:[#allocation3 + $0x28] sm:$0x1] %vm142_vm3, %v2064_v15  ;;  %v929_v30 = vrot.slane %v818_v16, 1  ;;  %v958_v43 = vrot.slane %v827_v22, 1  ;;  %v985_v55 = vrot.slane %v835_v31, 2 }
 0x309   :  { %v845_v56 = vld [vmem:[#allocation3 + $0x74] sm:$0x1]  ;;  %v1236_v1 = vsel %vm135_vm4, %v2064_v15, %v2048_v42  ;;  %v987_v3 = vrot.slane %v836_v37, 1  ;;  %v1011_v14 = vsel %vm541_vm10, %v1010_v45, %v1009_v57  ;;  %v858_v22 = vld [vmem:[#allocation3 + $0x26] sm:$0x1] }
 0x30a   :  { %v930_v41 = vsel %vm550_vm13, %v929_v30, %v928_v35  ;;  %v959_v11 = vsel %vm550_vm13, %v958_v43, %v957_v7  ;;  %v1016_v16 = vrot.slane %v845_v56, 1  ;;  %v986_v27 = vsel %vm547_vm12, %v985_v55, %v984_v59  ;;  %v852_v31 = vld [vmem:[#allocation3 + $0x55] sm:$0x1]  ;;  %v859_v35 = vld [vmem:[#allocation3 + $0x36] sm:$0x1] }
 0x30b   :  { %v2082_v51 = vpop.permute.xlu1 %356  ;;  %931 = vrot.lane.b32.xlu0 %v930_v41, %s1686_s29  ;;  %v1013_v29 = vsel %vm544_vm11, %v1012_v61, %v1011_v14  ;;  %v2111_v30 = vsel %vm784_vm6, %v1236_v1, %v1835_v47  ;;  %v988_v37 = vsel %vm550_vm13, %v987_v3, %v986_v27  ;;  %v866_v41 = vld [vmem:[#allocation3 + $0x17] sm:$0x1]  ;;  %v854_v45 = vld [vmem:[#allocation3 + $0x75] sm:$0x1]  ;;  %v860_v55 = vld [vmem:[#allocation3 + $0x46] sm:$0x1]  ;;  %v1063_v1 = vsel %vm532_vm5, %v1062_v23, %v856_v34 }
 0x30c   :  { %362 = vst.msk [vmem:[#allocation3 + $0x38] sm:$0x1] %vm142_vm3, %v2082_v51  ;;  %v1279_v52 = vsel %vm135_vm4, %v2082_v51, %v2064_v15  ;;  %v1015_v44 = vsel %vm547_vm12, %v1014_v8, %v1013_v29  ;;  %v1064_v56 = vrot.slane %v858_v22, 6  ;;  %v1041_v61 = vrot.slane %v852_v31, 3  ;;  %v862_v8 = vld [vmem:[#allocation3 + $0x66] sm:$0x1] }
 0x30d   :  { %v1017_v57 = vsel %vm550_vm13, %v1016_v16, %v1015_v44  ;;  %v1066_v3 = vrot.slane %v859_v35, 5  ;;  %v1281_v4 = vsel %vm784_vm6, %v1279_v52, %v2048_v42  ;;  %v1036_v7 = vsel %vm535_vm7, %v1035_v32, %v1034_v39  ;;  %v863_v16 = vld [vmem:[#allocation3 + $0x76] sm:$0x1]  ;;  %v868_v22 = vld [vmem:[#allocation3 + $0x37] sm:$0x1] }
 0x30e   :  { %v1043_v59 = vrot.slane %v853_v38, 2  ;;  %v1091_v10 = vrot.slane %v866_v41, 7  ;;  %v1038_v14 = vsel %vm538_vm8, %v1037_v40, %v1036_v7  ;;  %v1045_v52 = vrot.slane %v854_v45, 1  ;;  %v870_v41 = vld [vmem:[#allocation3 + $0x57] sm:$0x1] }
 0x30f   :  { %v2104_v25 = vpop.permute.xlu1 %374  ;;  %960 = vrot.lane.b32.xlu0 %v959_v11, %s1687_s30  ;;  %v1068_v19 = vrot.slane %v860_v55, 4  ;;  %v1040_v27 = vsel %vm541_vm10, %v1039_v54, %v1038_v14  ;;  %v1065_v29 = vsel %vm535_vm7, %v1064_v56, %v1063_v1  ;;  %v1070_v31 = vrot.slane %v861_v0, 3  ;;  %v871_v0 = vld [vmem:[#allocation3 + $0x67] sm:$0x1]  ;;  %v875_v1 = vld [vmem:[#allocation3 + $0x18] sm:$0x1] }
 0x310   :  { %380 = vst.msk [vmem:[#allocation3 + $0x48] sm:$0x1] %vm142_vm3, %v2104_v25  ;;  %v1322_v36 = vsel %vm135_vm4, %v2104_v25, %v2082_v51  ;;  %v1042_v32 = vsel %vm544_vm11, %v1041_v61, %v1040_v27  ;;  %v1067_v34 = vsel %vm538_vm8, %v1066_v3, %v1065_v29  ;;  %v1072_v35 = vrot.slane %v862_v8, 2 }
 0x311   :  { %v2122_v43 = vsel %vm784_vm6, %v1322_v36, %v2064_v15  ;;  %v865_v36 = vld [vmem:[#allocation3 + $0x7] sm:$0x1]  ;;  %v1093_v38 = vrot.slane %v867_v9, 6  ;;  %v1074_v40 = vrot.slane %v863_v16, 1  ;;  %v1095_v45 = vrot.slane %v868_v22, 5 }
 0x312   :  { %v1092_v44 = vsel %vm532_vm5, %v1091_v10, %v865_v36  ;;  %v1568_v54 = vmax.f32 %v2080_v48, 0.0  ;;  %v1283_v56 = vsel %vm787_vm9, %v1281_v4, %v1835_v47  ;;  %v1044_v61 = vsel %vm547_vm12, %v1043_v59, %v1042_v32 }
 0x313   :  { %v2129_v62 = vpop.permute.xlu1 %392  ;;  %989 = vrot.lane.b32.xlu0 %v988_v37, %s1685_s28  ;;  %v869_v37 = vld [vmem:[#allocation3 + $0x47] sm:$0x1]  ;;  %v1046_v48 = vsel %vm550_vm13, %v1045_v52, %v1044_v61  ;;  %v1094_v4 = vsel %vm535_vm7, %v1093_v38, %v1092_v44  ;;  %v1099_v59 = vrot.slane %v870_v41, 3  ;;  %v1101_v22 = vrot.slane %v871_v0, 2  ;;  %v877_v27 = vld [vmem:[#allocation3 + $0x38] sm:$0x1] }
 0x314   :  { %398 = vst.msk [vmem:[#allocation3 + $0x58] sm:$0x1] %vm142_vm3, %v2129_v62  ;;  %v1365_v11 = vsel %vm135_vm4, %v2129_v62, %v2104_v25  ;;  %v1572_v8 = vmul.f32 %v1568_v54, %v2039_v18  ;;  %v1097_v10 = vrot.slane %v869_v37, 4  ;;  %v1096_v52 = vsel %vm538_vm8, %v1095_v45, %v1094_v4 }
 0x315   :  { %v2141_v23 = vsel %vm784_vm6, %v1365_v11, %v2082_v51  ;;  %v876_v11 = vld [vmem:[#allocation3 + $0x28] sm:$0x1]  ;;  %v1120_v29 = vrot.slane %v875_v1, 7  ;;  %v1124_v45 = vrot.slane %v877_v27, 5  ;;  %v2211_v0 = vshrl.u32 %v1168_v17, 7 }
 0x316   :  { %1618 = vst.msk [vmem:[%s2845_s5 + $0x108] sm:$0xff] %vm135_vm4, %v1572_v8  ;;  %v1098_v41 = vsel %vm541_vm10, %v1097_v10, %v1096_v52 }
 0x317   :  { %v2147_v39 = vpop.permute.xlu1 %410  ;;  %1018 = vrot.lane.b32.xlu0 %v1017_v57, %s1683_s26  ;;  %v1069_v57 = vsel %vm541_vm10, %v1068_v19, %v1067_v34  ;;  %v872_v19 = vld [vmem:[#allocation3 + $0x77] sm:$0x1] }
 0x318   :  { %416 = vst.msk [vmem:[#allocation3 + $0x68] sm:$0x1] %vm142_vm3, %v2147_v39  ;;  %v1408_v55 = vsel %vm135_vm4, %v2147_v39, %v2129_v62  ;;  %v1071_v7 = vsel %vm544_vm11, %v1070_v31, %v1069_v57  ;;  %v1103_v44 = vrot.slane %v872_v19, 1 }
 0x319   :  { %v2163_v3 = vsel %vm784_vm6, %v1408_v55, %v2104_v25  ;;  %v1073_v9 = vsel %vm547_vm12, %v1072_v35, %v1071_v7  ;;  %v878_v35 = vld [vmem:[#allocation3 + $0x48] sm:$0x1]  ;;  %v1100_v55 = vsel %vm544_vm11, %v1099_v59, %v1098_v41 }
 0x31a   :  { %v1075_v16 = vsel %vm550_vm13, %v1074_v40, %v1073_v9  ;;  %v1122_v40 = vrot.slane %v876_v11, 6  ;;  %v1126_v57 = vrot.slane %v878_v35, 4 }
 0x31b   :  { %v2170_v14 = vpop.permute.xlu1 %428  ;;  %1047 = vrot.lane.b32.xlu0 %v1046_v48, %s1681_s4  ;;  %v1102_v48 = vsel %vm547_vm12, %v1101_v22, %v1100_v55 }
 0x31c   :  { %434 = vst.msk [vmem:[#allocation3 + $0x78] sm:$0x1] %vm142_vm3, %v2170_v14  ;;  %v1151_v18 = vsel %vm135_vm4, %v1835_v47, %v2170_v14  ;;  %v1195_v31 = vsel %vm784_vm6, %v2098_v6, %v2170_v14  ;;  %v1240_v32 = vsel %vm787_vm9, %v2111_v30, %v2170_v14  ;;  %v2192_v34 = vsel %vm790_vm14, %v1283_v56, %v2170_v14  ;;  %v879_v6 = vld [vmem:[#allocation3 + $0x58] sm:$0x1]  ;;  %v874_v56 = vld [vmem:[#allocation3 + $0x8] sm:$0x1] }
 0x31d   :  { %v1153_v36 = vsel %vm784_vm6, %v1151_v18, %v2147_v39  ;;  %v1197_v37 = vsel %vm787_vm9, %v1195_v31, %v2147_v39  ;;  %v1451_v38 = vsel %vm135_vm4, %v2170_v14, %v2147_v39  ;;  %v1121_v7 = vsel %vm532_vm5, %v1120_v29, %v874_v56 }
 0x31e   :  { %v2203_v30 = vsel %vm784_vm6, %v1451_v38, %v2129_v62  ;;  %v1155_v1 = vsel %vm787_vm9, %v1153_v36, %v2129_v62  ;;  %v1128_v8 = vrot.slane %v879_v6, 3  ;;  %v1123_v4 = vsel %vm535_vm7, %v1122_v40, %v1121_v7 }
 0x31f   :  { %v2206_v54 = vpop.permute.xlu1 %1497  ;;  %1076 = vrot.lane.b32.xlu0 %v1075_v16, %s1684_s27  ;;  %v880_v61 = vld [vmem:[#allocation3 + $0x68] sm:$0x1]  ;;  %v1157_v9 = vsel %vm790_vm14, %v1155_v1, %v2104_v25  ;;  %v1199_v17 = vsel %vm790_vm14, %v1197_v37, %v2129_v62  ;;  %v1104_v11 = vsel %vm550_vm13, %v1103_v44, %v1102_v48  ;;  %v1125_v16 = vsel %vm538_vm8, %v1124_v45, %v1123_v4  ;;  %v2271_v48 = vld [vmem:[#allocation2 + $0x88] sm:$0x1] }
 0x320   :  { %v1130_v10 = vrot.slane %v880_v61, 2  ;;  %v1159_v59 = vsel %vm793_vm15, %v1157_v9, %v2082_v51  ;;  %v1127_v27 = vsel %vm541_vm10, %v1126_v57, %v1125_v16  ;;  %v2235_v29 = vsub.s32 0, %v2211_v0 }
 0x321   :  { %v2228_v19 = vsel %vm796_vm0, %v1159_v59, %v2064_v15  ;;  %v1201_v18 = vsel %vm793_vm15, %v1199_v17, %v2104_v25  ;;  %v1212_v31 = vsub.s32 1, %v2211_v0  ;;  %v1129_v35 = vsel %vm544_vm11, %v1128_v8, %v1127_v27 }
 0x322   :  { %v1131_v37 = vsel %vm547_vm12, %v1130_v10, %v1129_v35  ;;  %v1203_v38 = vsel %vm796_vm0, %v1201_v18, %v2082_v51  ;;  %v1242_v6 = vsel %vm790_vm14, %v1240_v32, %v2147_v39  ;;  %v2846_v44 = vsub.s32 2, %v2211_v0 }
 0x323   :  { %v2230_v52 = vpop.permute.xlu1 %1503  ;;  %1105 = vrot.lane.b32.xlu0 %v1104_v11, %s1682_s25  ;;  %v881_v22 = vld [vmem:[#allocation3 + $0x78] sm:$0x1]  ;;  %v2251_v41 = vsel %vm799_vm1, %v1203_v38, %v2064_v15  ;;  %v1165_v56 = vadd.f32 %v1791_v5, %v1833_v46  ;;  %v1167_v61 = vadd.f32 %v1783_v63, %v1835_v47  ;;  %v1244_v57 = vsel %vm793_vm15, %v1242_v6, %v2129_v62 }
 0x324   :  { %v1132_v36 = vrot.slane %v881_v22, 1  ;;  %v1298_v1 = vsub.s32 3, %v2211_v0  ;;  %v1207_v4 = vadd.f32 %v1791_v5, %v2000_v20  ;;  %v1209_v10 = vadd.f32 %v1783_v63, %v2048_v42 }
 0x325   :  { %v1246_v59 = vsel %vm796_vm0, %v1244_v57, %v2104_v25 }
 0x326   :  { %v2247_v40 = vsel %vm550_vm13, %v1132_v36, %v1131_v37  ;;  %v2289_v35 = vsel %vm799_vm1, %v1246_v59, %v2082_v51 }
 0x327   :  { %v2254_v45 = vpop.permute.xlu1 %1509  ;;  %1531 = vrot.lane.b32.xlu0 %v1837_v49, %s1682_s25  ;;  %v1175_v55 = vrot.slane %v2247_v40, %v2235_v29  ;;  %v1217_v32 = vrot.slane %v2247_v40, %v1212_v31  ;;  %v1260_v17 = vrot.slane %v2247_v40, %v2846_v44 }
 0x329   :  { %v1177_v49 = vmul.f32 %v1175_v55, %v2062_v12  ;;  %v1179_v7 = vmul.f32 %v2271_v48, %v1175_v55  ;;  %v1219_v8 = vmul.f32 %v1217_v32, %v2062_v12  ;;  %v1221_v9 = vmul.f32 %v2271_v48, %v1217_v32 }
 0x32a   :  { %v1262_v36 = vmul.f32 %v1260_v17, %v2062_v12  ;;  %v1250_v32 = vadd.f32 %v1791_v5, %v2002_v21  ;;  %v1264_v57 = vmul.f32 %v2271_v48, %v1260_v17 }
 0x32b   :  { %v2285_v11 = vpop.permute.xlu1 %1515  ;;  %v1181_v16 = vmax.f32 %v1177_v49, 0.0  ;;  %v1183_v22 = vmax.f32 %v1179_v7, 0.0  ;;  %v1223_v27 = vmax.f32 %v1219_v8, 0.0  ;;  %v1225_v18 = vmax.f32 %v1221_v9, 0.0 }
 0x32c   :  { %v1266_v44 = vmax.f32 %v1262_v36, 0.0  ;;  %v1287_v49 = vsel %vm793_vm15, %v2192_v34, %v2147_v39  ;;  %v1268_v8 = vmax.f32 %v1264_v57, 0.0  ;;  %v2849_v57 = vsub.s32 5, %v2211_v0 }
 0x32d   :  { %v1185_v37 = vmul.f32 %v1181_v16, %v1165_v56  ;;  %v1187_v38 = vmul.f32 %v1183_v22, %v1167_v61  ;;  %v1227_v6 = vmul.f32 %v1223_v27, %v1207_v4  ;;  %v1229_v55 = vmul.f32 %v1225_v18, %v1209_v10 }
 0x32e   :  { %v1289_v34 = vsel %vm796_vm0, %v1287_v49, %v2129_v62  ;;  %v1303_v56 = vrot.slane %v2247_v40, %v1298_v1  ;;  %v1252_v61 = vadd.f32 %v1783_v63, %v2064_v15  ;;  %v1270_v9 = vmul.f32 %v1266_v44, %v1250_v32 }
 0x32f   :  { %v2298_v7 = vpop.permute.xlu1 %1521  ;;  %1189 = vst.msk [vmem:[%s2845_s5 + $0x8] sm:$0xff] %vm135_vm4, %v1185_v37  ;;  %1589 = vst.msk [vmem:[%s2845_s5 + $0x28] sm:$0xff] %vm135_vm4, %v1227_v6  ;;  %v2325_v4 = vsel %vm799_vm1, %v1289_v34, %v2104_v25  ;;  %v1293_v16 = vadd.f32 %v1791_v5, %v2010_v24  ;;  %v1326_v44 = vsel %vm787_vm9, %v2122_v43, %v2048_v42  ;;  %v1341_v22 = vsub.s32 4, %v2211_v0 }
 0x330   :  { %1191 = vst.msk [vmem:[%s2845_s5 + $0x18] sm:$0x1] %vm142_vm3, %v1187_v38  ;;  %1591 = vst.msk [vmem:[%s2845_s5 + $0x38] sm:$0x1] %vm142_vm3, %v1229_v55  ;;  %v1305_v10 = vmul.f32 %v1303_v56, %v2062_v12  ;;  %v1307_v59 = vmul.f32 %v2271_v48, %v1303_v56  ;;  %v1272_v17 = vmul.f32 %v1268_v8, %v1252_v61 }
 0x331   :  { %1593 = vst.msk [vmem:[%s2845_s5 + $0x48] sm:$0xff] %vm135_vm4, %v1270_v9  ;;  %v1295_v18 = vadd.f32 %v1783_v63, %v2082_v51  ;;  %v1328_v38 = vsel %vm790_vm14, %v1326_v44, %v1835_v47  ;;  %v1346_v34 = vrot.slane %v2247_v40, %v1341_v22  ;;  %v1369_v56 = vsel %vm787_vm9, %v2141_v23, %v2064_v15 }
 0x332   :  { %v1309_v36 = vmax.f32 %v1305_v10, 0.0  ;;  %v1311_v37 = vmax.f32 %v1307_v59, 0.0  ;;  %1595 = vst.msk [vmem:[%s2845_s5 + $0x58] sm:$0x1] %vm142_vm3, %v1272_v17  ;;  %v1330_v43 = vsel %vm793_vm15, %v1328_v38, %v2170_v14  ;;  %v1371_v8 = vsel %vm790_vm14, %v1369_v56, %v2048_v42 }
 0x333   :  { %v2339_v27 = vpop.permute.xlu1 %1527  ;;  %v1332_v32 = vsel %vm796_vm0, %v1330_v43, %v2147_v39  ;;  %v1348_v9 = vmul.f32 %v1346_v34, %v2062_v12  ;;  %v1350_v10 = vmul.f32 %v2271_v48, %v1346_v34  ;;  %v1373_v23 = vsel %vm793_vm15, %v1371_v8, %v1835_v47 }
 0x334   :  { %v1313_v6 = vmul.f32 %v1309_v36, %v1293_v16  ;;  %v1315_v55 = vmul.f32 %v1311_v37, %v1295_v18  ;;  %v2356_v49 = vsel %vm799_vm1, %v1332_v32, %v2129_v62  ;;  %v1336_v59 = vadd.f32 %v1791_v5, %v2015_v26 }
 0x335   :  { %v1375_v17 = vsel %vm796_vm0, %v1373_v23, %v2170_v14  ;;  %v1389_v16 = vrot.slane %v2247_v40, %v2849_v57  ;;  %v1412_v44 = vsel %vm787_vm9, %v2163_v3, %v2082_v51  ;;  %v1338_v18 = vadd.f32 %v1783_v63, %v2104_v25 }
 0x336   :  { %1597 = vst.msk [vmem:[%s2845_s5 + $0x68] sm:$0xff] %vm135_vm4, %v1313_v6  ;;  %v1352_v36 = vmax.f32 %v1348_v9, 0.0  ;;  %v1354_v37 = vmax.f32 %v1350_v10, 0.0  ;;  %v2394_v38 = vsel %vm799_vm1, %v1375_v17, %v2147_v39  ;;  %v2848_v32 = vsub.s32 6, %v2211_v0 }
 0x337   :  { %v2364_v61 = vpop.permute.xlu1 %933  ;;  %1599 = vst.msk [vmem:[%s2845_s5 + $0x78] sm:$0x1] %vm142_vm3, %v1315_v55  ;;  %v1391_v6 = vmul.f32 %v1389_v16, %v2062_v12  ;;  %v1393_v55 = vmul.f32 %v2271_v48, %v1389_v16  ;;  %v1379_v3 = vadd.f32 %v1791_v5, %v2021_v33  ;;  %v1414_v8 = vsel %vm790_vm14, %v1412_v44, %v2064_v15 }
 0x338   :  { %v1356_v34 = vmul.f32 %v1352_v36, %v1336_v59  ;;  %v1358_v56 = vmul.f32 %v1354_v37, %v1338_v18  ;;  %v1381_v9 = vadd.f32 %v1783_v63, %v2129_v62  ;;  %v1416_v17 = vsel %vm793_vm15, %v1414_v8, %v2048_v42 }
 0x339   :  { %v1395_v10 = vmax.f32 %v1391_v6, 0.0  ;;  %v1397_v23 = vmax.f32 %v1393_v55, 0.0  ;;  %v1418_v59 = vsel %vm796_vm0, %v1416_v17, %v1835_v47  ;;  %v2847_v36 = vsub.s32 7, %v2211_v0 }
 0x33a   :  { %1601 = vst.msk [vmem:[%s2845_s5 + $0x88] sm:$0xff] %vm135_vm4, %v1356_v34  ;;  %v2419_v18 = vsel %vm799_vm1, %v1418_v59, %v2170_v14  ;;  %v1432_v37 = vrot.slane %v2247_v40, %v2848_v32  ;;  %v1455_v6 = vsel %vm787_vm9, %v2203_v30, %v2104_v25  ;;  %v1424_v25 = vadd.f32 %v1783_v63, %v2147_v39 }
 0x33b   :  { %v963_v43 = vpop.permute.xlu1 %962  ;;  %1603 = vst.msk [vmem:[%s2845_s5 + $0x98] sm:$0x1] %vm142_vm3, %v1358_v56  ;;  %v1399_v62 = vmul.f32 %v1395_v10, %v1379_v3  ;;  %v1401_v44 = vmul.f32 %v1397_v23, %v1381_v9  ;;  %v1457_v56 = vsel %vm790_vm14, %v1455_v6, %v2082_v51  ;;  %v1475_v9 = vrot.slane %v2247_v40, %v2847_v36  ;;  %v808_v36 = vld [vmem:[#allocation3 + $0x60] sm:$0x1] }
 0x33c   :  { %v1434_v55 = vmul.f32 %v1432_v37, %v2062_v12  ;;  %v1436_v34 = vmul.f32 %v2271_v48, %v1432_v37  ;;  %v2442_v8 = vsel %vm793_vm15, %v1457_v56, %v2064_v15  ;;  %v1422_v10 = vadd.f32 %v1791_v5, %v2027_v53 }
 0x33d   :  { %1605 = vst.msk [vmem:[%s2845_s5 + $0xa8] sm:$0xff] %vm135_vm4, %v1399_v62  ;;  %v1477_v17 = vmul.f32 %v1475_v9, %v2062_v12  ;;  %v1479_v51 = vmul.f32 %v2271_v48, %v1475_v9  ;;  %v1467_v40 = vadd.f32 %v1783_v63, %v2170_v14  ;;  %v810_v12 = vld [vmem:[#allocation3 + $0x80] sm:$0x1] }
 0x33e   :  { %1607 = vst.msk [vmem:[%s2845_s5 + $0xb8] sm:$0x1] %vm142_vm3, %v1401_v44  ;;  %v1438_v30 = vmax.f32 %v1434_v55, 0.0  ;;  %v1440_v23 = vmax.f32 %v1436_v34, 0.0  ;;  %v1465_v44 = vadd.f32 %v1791_v5, %v2035_v13  ;;  %v1137_v5 = vsel %vm135_vm4, %v810_v12, %v2364_v61 }
 0x33f   :  { %v992_v16 = vpop.permute.xlu1 %991  ;;  %v1481_v37 = vmax.f32 %v1477_v17, 0.0  ;;  %v1483_v6 = vmax.f32 %v1479_v51, 0.0  ;;  %v1139_v63 = vsel %vm784_vm6, %v1137_v5, %v963_v43  ;;  %v1538_v61 = vsel %vm135_vm4, %v1839_v50, %v2206_v54 }
 0x340   :  { %v1442_v59 = vmul.f32 %v1438_v30, %v1422_v10  ;;  %v1444_v62 = vmul.f32 %v1440_v23, %v1424_v25  ;;  %v1141_v55 = vsel %vm787_vm9, %v1139_v63, %v992_v16  ;;  %v1540_v56 = vsel %vm784_vm6, %v1538_v61, %v2230_v52 }
 0x341   :  { %v1485_v39 = vmul.f32 %v1481_v37, %v1465_v44  ;;  %v1487_v48 = vmul.f32 %v1483_v6, %v1467_v40  ;;  %v1542_v25 = vsel %vm787_vm9, %v1540_v56, %v2254_v45  ;;  %v442_v44 = vld [vmem:[#allocation2 + $0x10] sm:$0x1]  ;;  %v443_v40 = vld [vmem:[#allocation2 + $0x20] sm:$0x1]  ;;  %v1150_v5 = vsel %vm135_vm4, %v1833_v46, %v2035_v13 }
 0x342   :  { %1609 = vst.msk [vmem:[%s2845_s5 + $0xc8] sm:$0xff] %vm135_vm4, %v1442_v59  ;;  %v1544_v16 = vsel %vm790_vm14, %v1542_v25, %v2285_v11  ;;  %v531_v37 = vrot.slane %v442_v44, 7  ;;  %v534_v6 = vrot.slane %v443_v40, 6  ;;  %v1192_v61 = vsel %vm135_vm4, %v2000_v20, %v1833_v46  ;;  %v446_v56 = vld [vmem:[#allocation2 + $0x50] sm:$0x1] }
 0x343   :  { %v1021_v3 = vpop.permute.xlu1 %1020  ;;  %1611 = vst.msk [vmem:[%s2845_s5 + $0xd8] sm:$0x1] %vm142_vm3, %v1444_v62  ;;  %1615 = vst.msk [vmem:[%s2845_s5 + $0xf8] sm:$0x1] %vm142_vm3, %v1487_v48  ;;  %v1546_v50 = vsel %vm793_vm15, %v1544_v16, %v2298_v7  ;;  %v441_v48 = vld [vmem:[#allocation2] sm:$0x1]  ;;  %v1194_v25 = vsel %vm784_vm6, %v1192_v61, %v2035_v13  ;;  %v1235_v16 = vsel %vm135_vm4, %v2002_v21, %v2000_v20 }
 0x344   :  { %1613 = vst.msk [vmem:[%s2845_s5 + $0xe8] sm:$0xff] %vm135_vm4, %v1485_v39  ;;  %v1143_v34 = vsel %vm790_vm14, %v1141_v55, %v1021_v3  ;;  %v1548_v54 = vsel %vm796_vm0, %v1546_v50, %v2339_v27  ;;  %v444_v39 = vld [vmem:[#allocation2 + $0x30] sm:$0x1]  ;;  %v533_v63 = vsel %vm532_vm5, %v531_v37, %v441_v48  ;;  %v445_v55 = vld [vmem:[#allocation2 + $0x40] sm:$0x1]  ;;  %v1196_v44 = vsel %vm787_vm9, %v1194_v25, %v2027_v53 }
 0x345   :  { %v540_v50 = vrot.slane %v445_v55, 4  ;;  %v804_v48 = vld [vmem:[#allocation3 + $0x20] sm:$0x1] }
 0x346   :  { %v806_v25 = vld [vmem:[#allocation3 + $0x40] sm:$0x1] }
 0x347   :  { %v1050_v15 = vpop.permute.xlu1 %1049  ;;  %v2500_v17 = vpop.permute.xlu0 %577  ;;  %v898_v32 = vrot.slane %v806_v25, 4 }
 0x348   :  { %v1145_v43 = vsel %vm793_vm15, %v1143_v34, %v1050_v15  ;;  %v537_v34 = vrot.slane %v444_v39, 5  ;;  %v1237_v39 = vsel %vm784_vm6, %v1235_v16, %v1833_v46  ;;  %v1364_v16 = vsel %vm135_vm4, %v2021_v33, %v2015_v26 }
 0x34b   :  { %v1079_v14 = vpop.permute.xlu1 %1078  ;;  %v2506_v7 = vpop.permute.xlu0 %606 }
 0x34c   :  { %v1147_v9 = vsel %vm796_vm0, %v1145_v43, %v1079_v14  ;;  %v536_v14 = vsel %vm535_vm7, %v534_v6, %v533_v63  ;;  %v1152_v43 = vsel %vm784_vm6, %v1150_v5, %v2027_v53  ;;  %v1407_v6 = vsel %vm135_vm4, %v2027_v53, %v2021_v33 }
 0x34d   :  { %v1239_v63 = vsel %vm787_vm9, %v1237_v39, %v2035_v13 }
 0x34f   :  { %v1108_v10 = vpop.permute.xlu1 %1107  ;;  %v2508_v62 = vpop.permute.xlu0 %635 }
 0x350   :  { %v1149_v30 = vsel %vm799_vm1, %v1147_v9, %v1108_v10  ;;  %v1278_v10 = vsel %vm135_vm4, %v2010_v24, %v2002_v21 }
 0x351   :  { %v2491_v3 = vrot.slane %v1149_v30, %v2235_v29  ;;  %v539_v30 = vsel %vm538_vm8, %v537_v34, %v536_v14  ;;  %v805_v34 = vld [vmem:[#allocation3 + $0x30] sm:$0x1] }
 0x352   :  { %v542_v40 = vsel %vm541_vm10, %v540_v50, %v539_v30  ;;  %v1198_v30 = vsel %vm790_vm14, %v1196_v44, %v2021_v33  ;;  %v1409_v50 = vsel %vm784_vm6, %v1407_v6, %v2015_v26 }
 0x353   :  { %v1565_v52 = vmul.f32 %v2491_v3, %v1985_v58  ;;  %v1534_v23 = vpop.permute.xlu1 %1533  ;;  %v2510_v27 = vpop.permute.xlu0 %664  ;;  %v1411_v25 = vsel %vm787_vm9, %v1409_v50, %v2010_v24 }
 0x354   :  { %v1550_v45 = vsel %vm799_vm1, %v1548_v54, %v1534_v23  ;;  %v803_v54 = vld [vmem:[#allocation3 + $0x10] sm:$0x1]  ;;  %v448_v23 = vld [vmem:[#allocation2 + $0x70] sm:$0x1] }
 0x355   :  { %v1569_v51 = vmax.f32 %v1565_v52, 0.0  ;;  %v1553_v11 = vadd.f32 %v1781_v60, %v1550_v45  ;;  %v447_v52 = vld [vmem:[#allocation2 + $0x60] sm:$0x1]  ;;  %v543_v45 = vrot.slane %v446_v56, 3  ;;  %v892_v5 = vrot.slane %v803_v54, 7 }
 0x356   :  { %v546_v14 = vrot.slane %v447_v52, 2  ;;  %v549_v55 = vrot.slane %v448_v23, 1  ;;  %v1450_v54 = vsel %vm135_vm4, %v2035_v13, %v2027_v53  ;;  %v802_v52 = vld [vmem:[#allocation3] sm:$0x1]  ;;  %v807_v23 = vld [vmem:[#allocation3 + $0x50] sm:$0x1] }
 0x357   :  { %v1573_v59 = vmul.f32 %v1569_v51, %v1553_v11  ;;  %v2512_v15 = vpop.permute.xlu0 %693  ;;  %v1154_v51 = vsel %vm787_vm9, %v1152_v43, %v2021_v33  ;;  %v1280_v11 = vsel %vm784_vm6, %v1278_v10, %v2000_v20  ;;  %v545_v10 = vsel %vm544_vm11, %v543_v45, %v542_v40 }
 0x358   :  { %v1156_v61 = vsel %vm790_vm14, %v1154_v51, %v2015_v26  ;;  %v1282_v56 = vsel %vm787_vm9, %v1280_v11, %v1833_v46  ;;  %v894_v51 = vrot.slane %v804_v48, 6  ;;  %v893_v45 = vsel %vm532_vm5, %v892_v5, %v802_v52 }
 0x359   :  { %1619 = vst [vmem:[%s2845_s5 + $0x110] sm:$0x1] %v1573_v59  ;;  %v1321_v59 = vsel %vm135_vm4, %v2015_v26, %v2010_v24  ;;  %v1158_v44 = vsel %vm793_vm15, %v1156_v61, %v2010_v24  ;;  %v1241_v40 = vsel %vm790_vm14, %v1239_v63, %v2027_v53  ;;  %v1284_v6 = vsel %vm790_vm14, %v1282_v56, %v2035_v13  ;;  %v809_v61 = vld [vmem:[#allocation3 + $0x70] sm:$0x1] }
 0x35a   :  { %v1323_v43 = vsel %vm784_vm6, %v1321_v59, %v2002_v21  ;;  %v896_v59 = vrot.slane %v805_v34, 5  ;;  %v548_v39 = vsel %vm547_vm12, %v546_v14, %v545_v10  ;;  %v1200_v48 = vsel %vm793_vm15, %v1198_v30, %v2015_v26 }
 0x35b   :  { %v2514_v12 = vpop.permute.xlu0 %722  ;;  %v1366_v5 = vsel %vm784_vm6, %v1364_v16, %v2010_v24  ;;  %v1452_v34 = vsel %vm784_vm6, %v1450_v54, %v2021_v33  ;;  %v900_v52 = vrot.slane %v807_v23, 3  ;;  %v1325_v63 = vsel %vm787_vm9, %v1323_v43, %v2000_v20 }
 0x35c   :  { %v895_v56 = vsel %vm535_vm7, %v894_v51, %v893_v45  ;;  %v1160_v14 = vsel %vm796_vm0, %v1158_v44, %v2002_v21  ;;  %v1243_v10 = vsel %vm793_vm15, %v1241_v40, %v2021_v33  ;;  %v902_v16 = vrot.slane %v808_v36, 2 }
 0x35d   :  { %v897_v30 = vsel %vm538_vm8, %v896_v59, %v895_v56  ;;  %v1202_v54 = vsel %vm796_vm0, %v1200_v48, %v2010_v24  ;;  %v1286_v43 = vsel %vm793_vm15, %v1284_v6, %v2027_v53  ;;  %v904_v51 = vrot.slane %v809_v61, 1 }
 0x35e   :  { %v899_v23 = vsel %vm541_vm10, %v898_v32, %v897_v30  ;;  %v1368_v45 = vsel %vm787_vm9, %v1366_v5, %v2002_v21  ;;  %v1454_v44 = vsel %vm787_vm9, %v1452_v34, %v2015_v26  ;;  %v551_v50 = vsel %vm550_vm13, %v549_v55, %v548_v39 }
 0x35f   :  { %v2526_v9 = vpop.permute.xlu0 %751  ;;  %v901_v59 = vsel %vm544_vm11, %v900_v52, %v899_v23  ;;  %v1162_v36 = vsel %vm799_vm1, %v1160_v14, %v2000_v20  ;;  %v1245_v40 = vsel %vm796_vm0, %v1243_v10, %v2015_v26  ;;  %v1163_v32 = vsel %vm799_vm1, %v2228_v19, %v2048_v42 }
 0x360   :  { %v1204_v48 = vsel %vm799_vm1, %v1202_v54, %v2002_v21  ;;  %v1288_v5 = vsel %vm796_vm0, %v1286_v43, %v2021_v33  ;;  %v1413_v55 = vsel %vm790_vm14, %v1411_v25, %v2002_v21  ;;  %v903_v39 = vsel %vm547_vm12, %v902_v16, %v901_v59 }
 0x361   :  { %v1327_v34 = vsel %vm790_vm14, %v1325_v63, %v1833_v46  ;;  %v1370_v61 = vsel %vm790_vm14, %v1368_v45, %v2000_v20  ;;  %v1456_v19 = vsel %vm790_vm14, %v1454_v44, %v2010_v24  ;;  %v905_v52 = vsel %vm550_vm13, %v904_v51, %v903_v39 }
 0x362   :  { %v2632_v56 = vadd.f32 %v1789_v2, %v1162_v36  ;;  %v1247_v14 = vsel %vm799_vm1, %v1245_v40, %v2010_v24  ;;  %v1329_v10 = vsel %vm793_vm15, %v1327_v34, %v2035_v13  ;;  %v2639_v25 = vadd.f32 %v1781_v60, %v1163_v32 }
 0x363   :  { %v2642_v63 = vadd.f32 %v1789_v2, %v1204_v48  ;;  %v1290_v30 = vsel %vm799_vm1, %v1288_v5, %v2015_v26  ;;  %v1415_v16 = vsel %vm793_vm15, %v1413_v55, %v2000_v20  ;;  %v782_v54 = vsel %vm135_vm4, %v551_v50, %v2500_v17 }
 0x364   :  { %v2652_v24 = vadd.f32 %v1781_v60, %v2251_v41  ;;  %v1372_v23 = vsel %vm793_vm15, %v1370_v61, %v1833_v46  ;;  %v1458_v51 = vsel %vm793_vm15, %v1456_v19, %v2002_v21  ;;  %v785_v26 = vsel %vm784_vm6, %v782_v54, %v2506_v7 }
 0x365   :  { %v2661_v45 = vadd.f32 %v1789_v2, %v1247_v14  ;;  %v1331_v17 = vsel %vm796_vm0, %v1329_v10, %v2027_v53  ;;  %v1374_v44 = vsel %vm796_vm0, %v1372_v23, %v2035_v13  ;;  %v788_v41 = vsel %vm787_vm9, %v785_v26, %v2508_v62 }
 0x366   :  { %v1251_v50 = vadd.f32 %v1781_v60, %v2289_v35  ;;  %v1292_v21 = vadd.f32 %v1789_v2, %v1290_v30  ;;  %v1417_v7 = vsel %vm796_vm0, %v1415_v16, %v1833_v46  ;;  %v791_v59 = vsel %vm790_vm14, %v788_v41, %v2510_v27 }
 0x367   :  { %v1460_v40 = vsel %vm796_vm0, %v1458_v51, %v2000_v20  ;;  %v1461_v62 = vsel %vm796_vm0, %v2442_v8, %v2048_v42  ;;  %v794_v35 = vsel %vm793_vm15, %v791_v59, %v2512_v15  ;;  %v1333_v27 = vsel %vm799_vm1, %v1331_v17, %v2021_v33 }
 0x368   :  { %v797_v20 = vsel %vm796_vm0, %v794_v35, %v2514_v12  ;;  %v1294_v42 = vadd.f32 %v1781_v60, %v2325_v4  ;;  %v1419_v8 = vsel %vm799_vm1, %v1417_v7, %v2035_v13  ;;  %v1463_v12 = vsel %vm799_vm1, %v1461_v62, %v1835_v47 }
 0x369   :  { %v2700_v15 = vsel %vm799_vm1, %v797_v20, %v2526_v9  ;;  %v2713_v13 = vadd.f32 %v1781_v60, %v2356_v49  ;;  %v2724_v47 = vadd.f32 %v1789_v2, %v1419_v8  ;;  %v2734_v39 = vadd.f32 %v1781_v60, %v1463_v12 }
 0x36a   :  { %v2851_v10 = vsub.s32 5, %v2211_v0 }
 0x37d   :  { %v2547_v37 = vpop.permute.xlu0 %931 }
 0x37e   :  { %v1136_v36 = vsel %vm135_vm4, %v905_v52, %v2547_v37  ;;  %v1376_v37 = vsel %vm799_vm1, %v1374_v44, %v2027_v53  ;;  %v1462_v53 = vsel %vm799_vm1, %v1460_v40, %v1833_v46  ;;  %v2721_v46 = vadd.f32 %v1781_v60, %v2394_v38 }
 0x37f   :  { %v2716_v4 = vadd.f32 %v1789_v2, %v1376_v37  ;;  %v2731_v49 = vadd.f32 %v1789_v2, %v1462_v53  ;;  %v2739_v38 = vmul.f32 %v2491_v3, %v2700_v15  ;;  %v2852_v3 = vsub.s32 6, %v2211_v0 }
 0x381   :  { %v2573_v11 = vpop.permute.xlu0 %960 }
 0x382   :  { %v1138_v32 = vsel %vm784_vm6, %v1136_v36, %v2573_v11  ;;  %v2709_v11 = vadd.f32 %v1789_v2, %v1333_v27 }
 0x385   :  { %v990_v57 = vpop.permute.xlu0 %989 }
 0x386   :  { %v1140_v5 = vsel %vm787_vm9, %v1138_v32, %v990_v57 }
 0x389   :  { %v1019_v6 = vpop.permute.xlu0 %1018 }
 0x38a   :  { %v1142_v33 = vsel %vm790_vm14, %v1140_v5, %v1019_v6  ;;  %v2728_v6 = vadd.f32 %v1781_v60, %v2419_v18  ;;  %v2850_v18 = vsub.s32 2, %v2211_v0 }
 0x38d   :  { %v1048_v43 = vpop.permute.xlu0 %1047 }
 0x38e   :  { %v1144_v57 = vsel %vm793_vm15, %v1142_v33, %v1048_v43 }
 0x391   :  { %v1077_v48 = vpop.permute.xlu0 %1076 }
 0x392   :  { %v1146_v9 = vsel %vm796_vm0, %v1144_v57, %v1077_v48 }
 0x395   :  { %v1106_v55 = vpop.permute.xlu0 %1105 }
 0x396   :  { %v1148_v34 = vsel %vm799_vm1, %v1146_v9, %v1106_v55 }
 0x397   :  { %v1171_v61 = vrot.slane %v1148_v34, %v2235_v29  ;;  %v1213_v19 = vrot.slane %v1148_v34, %v1212_v31  ;;  %v1256_v52 = vrot.slane %v1148_v34, %v2850_v18  ;;  %v1299_v14 = vrot.slane %v1148_v34, %v1298_v1 }
 0x398   :  { %v1342_v60 = vrot.slane %v1148_v34, %v1341_v22  ;;  %v1385_v30 = vrot.slane %v1148_v34, %v2851_v10  ;;  %v1428_v16 = vrot.slane %v1148_v34, %v2852_v3  ;;  %v2853_v29 = vsub.s32 7, %v2211_v0 }
 0x399   :  { %v1176_v31 = vmul.f32 %v1171_v61, %v2700_v15  ;;  %v1178_v43 = vmul.f32 %v1171_v61, %v1985_v58  ;;  %v1218_v23 = vmul.f32 %v1213_v19, %v2700_v15  ;;  %v1220_v1 = vmul.f32 %v1213_v19, %v1985_v58  ;;  %v1532_v19 = vpop.permute.xlu0 %1531 }
 0x39a   :  { %v1471_v54 = vrot.slane %v1148_v34, %v2853_v29  ;;  %v1261_v51 = vmul.f32 %v1256_v52, %v2700_v15  ;;  %v1263_v22 = vmul.f32 %v1256_v52, %v1985_v58  ;;  %v1304_v26 = vmul.f32 %v1299_v14, %v2700_v15 }
 0x39b   :  { %v1306_v17 = vmul.f32 %v1299_v14, %v1985_v58  ;;  %v1180_v44 = vmax.f32 %v1176_v31, 0.0  ;;  %v1182_v41 = vmax.f32 %v1178_v43, 0.0  ;;  %v1222_v0 = vmax.f32 %v1218_v23, 0.0 }
 0x39c   :  { %v1224_v7 = vmax.f32 %v1220_v1, 0.0  ;;  %v1265_v59 = vmax.f32 %v1261_v51, 0.0  ;;  %v1267_v36 = vmax.f32 %v1263_v22, 0.0  ;;  %v1308_v40 = vmax.f32 %v1304_v26, 0.0 }
 0x39d   :  { %v1310_v62 = vmax.f32 %v1306_v17, 0.0  ;;  %v1184_v35 = vmul.f32 %v1180_v44, %v2632_v56  ;;  %v1186_v32 = vmul.f32 %v1182_v41, %v2639_v25  ;;  %v1226_v48 = vmul.f32 %v1222_v0, %v2642_v63 }
 0x39e   :  { %v1228_v27 = vmul.f32 %v1224_v7, %v2652_v24  ;;  %v1269_v37 = vmul.f32 %v1265_v59, %v2661_v45  ;;  %v1271_v20 = vmul.f32 %v1267_v36, %v1251_v50  ;;  %v1312_v5 = vmul.f32 %v1308_v40, %v1292_v21 }
 0x39f   :  { %v1314_v8 = vmul.f32 %v1310_v62, %v1294_v42  ;;  %1188 = vst [vmem:[%s2845_s5] sm:$0xff] %v1184_v35  ;;  %1190 = vst [vmem:[%s2845_s5 + $0x10] sm:$0x1] %v1186_v32  ;;  %v1347_v56 = vmul.f32 %v1342_v60, %v2700_v15  ;;  %v1349_v25 = vmul.f32 %v1342_v60, %v1985_v58 }
 0x3a0   :  { %1588 = vst [vmem:[%s2845_s5 + $0x20] sm:$0xff] %v1226_v48  ;;  %1590 = vst [vmem:[%s2845_s5 + $0x30] sm:$0x1] %v1228_v27  ;;  %v1390_v63 = vmul.f32 %v1385_v30, %v2700_v15  ;;  %v1392_v24 = vmul.f32 %v1385_v30, %v1985_v58  ;;  %v1433_v45 = vmul.f32 %v1428_v16, %v2700_v15 }
 0x3a1   :  { %1592 = vst [vmem:[%s2845_s5 + $0x40] sm:$0xff] %v1269_v37  ;;  %1594 = vst [vmem:[%s2845_s5 + $0x50] sm:$0x1] %v1271_v20  ;;  %v1435_v50 = vmul.f32 %v1428_v16, %v1985_v58  ;;  %v1476_v21 = vmul.f32 %v1471_v54, %v2700_v15  ;;  %v1478_v42 = vmul.f32 %v1471_v54, %v1985_v58  ;;  %v1351_v33 = vmax.f32 %v1347_v56, 0.0 }
 0x3a2   :  { %1596 = vst [vmem:[%s2845_s5 + $0x60] sm:$0xff] %v1312_v5  ;;  %1598 = vst [vmem:[%s2845_s5 + $0x70] sm:$0x1] %v1314_v8  ;;  %v1353_v53 = vmax.f32 %v1349_v25, 0.0  ;;  %v1394_v12 = vmax.f32 %v1390_v63, 0.0  ;;  %v1396_v57 = vmax.f32 %v1392_v24, 0.0 }
 0x3a3   :  { %v1437_v9 = vmax.f32 %v1433_v45, 0.0  ;;  %v1439_v55 = vmax.f32 %v1435_v50, 0.0  ;;  %v1480_v34 = vmax.f32 %v1476_v21, 0.0  ;;  %v1482_v61 = vmax.f32 %v1478_v42, 0.0 }
 0x3a4   :  { %v1355_v18 = vmul.f32 %v1351_v33, %v2709_v11  ;;  %v1357_v52 = vmul.f32 %v1353_v53, %v2713_v13  ;;  %v1398_v14 = vmul.f32 %v1394_v12, %v2716_v4  ;;  %v1400_v60 = vmul.f32 %v1396_v57, %v2721_v46 }
 0x3a5   :  { %v1441_v15 = vmul.f32 %v1437_v9, %v2724_v47  ;;  %v1443_v58 = vmul.f32 %v1439_v55, %v2728_v6  ;;  %v1484_v10 = vmul.f32 %v1480_v34, %v2731_v49  ;;  %v1486_v30 = vmul.f32 %v1482_v61, %v2734_v39 }
 0x3a6   :  { %1600 = vst [vmem:[%s2845_s5 + $0x80] sm:$0xff] %v1355_v18  ;;  %1602 = vst [vmem:[%s2845_s5 + $0x90] sm:$0x1] %v1357_v52  ;;  %v1549_v11 = vsel %vm799_vm1, %v2069_v28, %v1532_v19  ;;  %v1567_v28 = vmax.f32 %v2739_v38, 0.0 }
 0x3a7   :  { %1604 = vst [vmem:[%s2845_s5 + $0xa0] sm:$0xff] %v1398_v14  ;;  %1606 = vst [vmem:[%s2845_s5 + $0xb0] sm:$0x1] %v1400_v60  ;;  %v1551_v13 = vadd.f32 %v1789_v2, %v1549_v11 }
 0x3a8   :  { %1608 = vst [vmem:[%s2845_s5 + $0xc0] sm:$0xff] %v1441_v15  ;;  %1610 = vst [vmem:[%s2845_s5 + $0xd0] sm:$0x1] %v1443_v58 }
 0x3a9   :  { %1612 = vst [vmem:[%s2845_s5 + $0xe0] sm:$0xff] %v1484_v10  ;;  %1614 = vst [vmem:[%s2845_s5 + $0xf0] sm:$0x1] %v1486_v30  ;;  %v1571_v4 = vmul.f32 %v1567_v28, %v1551_v13 }
 0x3ab   :  { %1617 = vst [vmem:[%s2845_s5 + $0x100] sm:$0xff] %v1571_v4 }

</bundles_post_ra>
